<compile_context>
chip_gen: v6e
topology: v6e:2x2x1
jax: 0.10.0
libtpu: 0.0.40
codegen_flags: <defaults>
</compile_context>

<pallas_src>
import functools

import jax
import jax.numpy as jnp
from jax import lax
from jax.experimental import pallas as pl
from jax.experimental.pallas import tpu as pltpu

LN_EPS = 0.007   # ln_epsilon in SalukiModel
BN_EPS = 1e-5    # nn.BatchNorm1d default eps


def _pick_vmem_limit():
    # v5e/v6e have 128 MiB physical VMEM -> raise the scoped limit; v7x has
    # 64 MiB -> stay at ~48 MiB.  Guarded so it can never break compilation.
    try:
        cap = pltpu.get_tpu_info().vmem_capacity_bytes
    except Exception:
        cap = 64 * 1024 * 1024
    return int(min(cap * 3 // 4, 100 * 1024 * 1024))


_VMEM_LIMIT = _pick_vmem_limit()


def _compiler_params(dims):
    return pltpu.CompilerParams(dimension_semantics=dims,
                                vmem_limit_bytes=_VMEM_LIMIT)


# ----------------------------------------------------------------------------
# Kernels
# ----------------------------------------------------------------------------

def _ln_relu(y, n_elems, eps):
    # LayerNorm over the whole (L, C) slab (no affine), one-pass stats, + ReLU.
    s = jnp.sum(y)
    s2 = jnp.sum(y * y)
    mean = s / float(n_elems)
    var = s2 / float(n_elems) - mean * mean
    return jnp.maximum((y - mean) * lax.rsqrt(var + eps), 0.0)


def conv_stack_kernel(x_ref, w0_ref, wmid_ref, bmid_ref, wih_ref, bgi_ref,
                      gi_ref, conv_buf, *, k_taps, num_layers, ln_eps):
    # x_ref   : (1, L, Cin0) one batch element, length-major
    # w0_ref  : (K, Cin0, C) bf16 conv0 taps (no bias)
    # wmid_ref: (num_layers, K, C, C) bf16 mid conv taps
    # bmid_ref: (num_layers, 1, C) f32 mid conv biases
    # wih_ref : (C, 3H) bf16 GRU input-projection weight (transposed)
    # bgi_ref : (1, 3H) f32 = b_ih + [b_hr, b_hz, 0]
    # gi_ref  : (1, T, 3H) f32 output: hoisted GRU gate input projections
    # conv_buf: (max_lc, C) f32 VMEM scratch for the pool's even/odd reads
    L = x_ref.shape[1]
    C = w0_ref.shape[2]

    x = x_ref[0]                                            # (L, Cin0) f32

    # conv0: K accumulating tap matmuls (bf16 x bf16 -> f32), no staging buffer.
    lc = L - k_taps + 1
    acc = jnp.zeros((lc, C), jnp.float32)
    for k in range(k_taps):
        acc = acc + jnp.dot(x[k:k + lc, :].astype(jnp.bfloat16), w0_ref[k],
                            preferred_element_type=jnp.float32)
    y = acc
    cur = lc

    for i in range(num_layers):
        # LayerNorm + ReLU (one-pass stats).
        xa = _ln_relu(y, cur * C, ln_eps)
        # TODO(synk): nn.Dropout is identity in eval mode; train dropout omitted.

        # conv_i: K tap matmuls on sublane-shifted slices.
        lc = cur - k_taps + 1
        acc = jnp.zeros((lc, C), jnp.float32)
        for k in range(k_taps):
            acc = acc + jnp.dot(xa[k:k + lc, :].astype(jnp.bfloat16),
                                wmid_ref[i, k],
                                preferred_element_type=jnp.float32)
        acc = acc + bmid_ref[i]

        # MaxPool1d(2): park the conv output in VMEM scratch and take the max
        # of even/odd rows with stride-2 reads (activations stay on chip).
        conv_buf[0:lc, :] = acc
        lp = lc // 2
        y = jnp.maximum(conv_buf[pl.ds(0, lp, stride=2), :],
                        conv_buf[pl.ds(1, lp, stride=2), :])
        cur = lp

    # Final LayerNorm + ReLU, then the hoisted GRU input projection
    # (T, C) @ (C, 3H) with b_ih + [b_hr, b_hz, 0] folded into the bias.
    xa = _ln_relu(y, cur * C, ln_eps)
    gi_ref[0] = jnp.dot(xa.astype(jnp.bfloat16), wih_ref[...],
                        preferred_element_type=jnp.float32) + bgi_ref[...]


def gru_head_kernel(gi_ref, whh_ref, bhn_ref, w2_ref, head_ref, o_ref, *, T):
    # gi_ref  : (T, B, 3H) f32 time-major staged gate input projections
    # whh_ref : (H, 3H) bf16 packed hidden weights [W_hr^T | W_hz^T | W_hn^T]
    # bhn_ref : (1, H) f32 = b_hn
    # w2_ref  : (H, H) bf16 = dense2 weight^T
    # head_ref: (4, H) f32 = [bn2 scale, bn2 shift, bn3 scale, bn3 shift + scale*b2]
    # o_ref   : (B, H) f32
    B = o_ref.shape[0]
    H = o_ref.shape[1]
    whh = whh_ref[...]
    bhn = bhn_ref[...]

    def step(s, h):
        t = T - 1 - s                                       # go_backwards + flip
        g = gi_ref[t]                                       # (B, 3H)
        gh = jnp.dot(h.astype(jnp.bfloat16), whh,           # one packed matmul
                     preferred_element_type=jnp.float32)    # (B, 3H)
        r = jax.nn.sigmoid(g[:, 0:H] + gh[:, 0:H])
        z = jax.nn.sigmoid(g[:, H:2 * H] + gh[:, H:2 * H])
        n = jnp.tanh(g[:, 2 * H:3 * H] + r * (gh[:, 2 * H:3 * H] + bhn))
        return (1.0 - z) * n + z * h

    h = lax.fori_loop(0, T, step, jnp.zeros((B, H), jnp.float32))

    # Head: bn2 -> ReLU -> dense2 -> (dropout=identity) -> bn3 -> ReLU
    hp = head_ref[...]
    y = jnp.maximum(h * hp[0:1, :] + hp[1:2, :], 0.0)
    y = jnp.dot(y.astype(jnp.bfloat16), w2_ref[...],
                preferred_element_type=jnp.float32)
    o_ref[...] = jnp.maximum(y * hp[2:3, :] + hp[3:4, :], 0.0)


# ----------------------------------------------------------------------------
# Wrappers (host-side weight packing + pallas_call setup)
# ----------------------------------------------------------------------------

def conv_stack_call(x, w0, wmid, bmid, wih_t, bgi, *, k_taps, num_layers):
    B, L, cin = x.shape
    C = w0.shape[2]
    h3 = wih_t.shape[1]

    cur = L - k_taps + 1
    max_lc = 0
    for _ in range(num_layers):
        lc = cur - k_taps + 1
        # TODO(synk): odd intermediate lengths (pool drops the trailing row)
        #             are not handled by the even/odd stride-2 pool.
        assert lc % 2 == 0, "sequence length must stay even through the pools"
        max_lc = max(max_lc, lc)
        cur = lc // 2
    T = cur

    kernel = functools.partial(conv_stack_kernel, k_taps=k_taps,
                               num_layers=num_layers, ln_eps=LN_EPS)
    # grid=(B,) parallel (megacore friendly); per-sample LayerNorm stats keep
    # batch on the grid axis rather than folding it into the matmul M dim.
    return pl.pallas_call(
        kernel,
        out_shape=jax.ShapeDtypeStruct((B, T, h3), jnp.float32),
        grid=(B,),
        in_specs=[
            pl.BlockSpec((1, L, cin), lambda i: (i, 0, 0)),
            pl.BlockSpec(w0.shape, lambda i: (0, 0, 0)),
            pl.BlockSpec(wmid.shape, lambda i: (0, 0, 0, 0)),
            pl.BlockSpec(bmid.shape, lambda i: (0, 0, 0)),
            pl.BlockSpec(wih_t.shape, lambda i: (0, 0)),
            pl.BlockSpec(bgi.shape, lambda i: (0, 0)),
        ],
        out_specs=pl.BlockSpec((1, T, h3), lambda i: (i, 0, 0)),
        scratch_shapes=[pltpu.VMEM((max_lc, C), jnp.float32)],
        compiler_params=_compiler_params(("parallel",)),
    )(x, w0, wmid, bmid, wih_t, bgi)


def gru_head_call(gi_t, whh, bhn, w2, head):
    T, B, h3 = gi_t.shape
    H = h3 // 3
    return pl.pallas_call(
        functools.partial(gru_head_kernel, T=T),
        out_shape=jax.ShapeDtypeStruct((B, H), jnp.float32),
        grid=(1,),
        in_specs=[
            pl.BlockSpec(gi_t.shape, lambda i: (0, 0, 0)),
            pl.BlockSpec(whh.shape, lambda i: (0, 0)),
            pl.BlockSpec(bhn.shape, lambda i: (0, 0)),
            pl.BlockSpec(w2.shape, lambda i: (0, 0)),
            pl.BlockSpec(head.shape, lambda i: (0, 0)),
        ],
        out_specs=pl.BlockSpec((B, H), lambda i: (0, 0)),
        compiler_params=_compiler_params(("arbitrary",)),
    )(gi_t, whh, bhn, w2, head)


def _bn_scale_shift(bn):
    gamma, beta, rmean, rvar = bn[0], bn[1], bn[2], bn[3]
    scale = gamma * lax.rsqrt(rvar + BN_EPS)
    shift = beta - rmean * scale
    return scale, shift


@jax.jit
def saluki_forward(x, params):
    # x: (B, seq_depth, L) as in the PyTorch module (NCL).
    # TODO(synk): StochasticShift is a train-time augmentation; identity at inference.
    x = jnp.transpose(x, (0, 2, 1))                        # (B, L, Cin) length-major

    w0 = params["conv0_w"]                                 # (C, Cin, K)
    C, _, K = w0.shape
    num_layers = len(params["mid"])
    assert num_layers >= 1

    # Conv weights as per-tap (Cin, Cout) matrices, bf16 operands.
    w0p = jnp.transpose(w0, (2, 1, 0)).astype(jnp.bfloat16)               # (K, Cin, C)
    wmid = jnp.stack([jnp.transpose(w, (2, 1, 0)) for (w, _) in params["mid"]]
                     ).astype(jnp.bfloat16)                               # (NL, K, C, C)
    bmid = jnp.stack([b.reshape(1, C) for (_, b) in params["mid"]]
                     ).astype(jnp.float32)                                # (NL, 1, C)

    H = params["gru_w_hh"].shape[1]
    wih_t = params["gru_w_ih"].T.astype(jnp.bfloat16)                     # (C, 3H)
    b_ih = params["gru_b_ih"]
    b_hh = params["gru_b_hh"]
    bgi = (b_ih + jnp.concatenate([b_hh[:2 * H], jnp.zeros((H,), jnp.float32)])
           ).reshape(1, 3 * H)
    whh = params["gru_w_hh"].T.astype(jnp.bfloat16)                       # (H, 3H) packed
    bhn = b_hh[2 * H:].reshape(1, H)

    s2, t2 = _bn_scale_shift(params["bn2"])
    s3, t3 = _bn_scale_shift(params["bn3"])
    t3 = t3 + s3 * params["dense2_b"]                       # fold dense2 bias into bn3 shift
    head = jnp.stack([s2, t2, s3, t3]).astype(jnp.float32)  # (4, H)
    w2 = params["dense2_w"].T.astype(jnp.bfloat16)          # (H, H)

    # Stage 1: fused conv stack + final LN/ReLU + hoisted GRU input projection.
    gi = conv_stack_call(x, w0p, wmid, bmid, wih_t, bgi,
                         k_taps=K, num_layers=num_layers)   # (B, T, 3H)

    # Stage the gates time-major so each serial GRU step reads one contiguous
    # (B, 3H) row block (tiny HBM transpose, outside the recurrence).
    gi_t = jnp.transpose(gi, (1, 0, 2))                     # (T, B, 3H)

    # Stage 2: batched GRU recurrence ((B,H)@(H,3H) per step) + fused head.
    return gru_head_call(gi_t, whh, bhn, w2, head)


# ----------------------------------------------------------------------------
# Deterministic parameter init + pure-JAX (f32) reference
# ----------------------------------------------------------------------------

def init_params(key, *, seq_depth, filters, kernel_size, num_layers):
    ks = list(jax.random.split(key, 8 + 2 * num_layers))
    it = iter(ks)

    def nrm(k, shape, scale):
        return scale * jax.random.normal(k, shape, jnp.float32)

    p = {}
    p["conv0_w"] = nrm(next(it), (filters, seq_depth, kernel_size), 0.3)
    mid = []
    for _ in range(num_layers):
        w = nrm(next(it), (filters, filters, kernel_size), 0.15)
        b = nrm(next(it), (filters,), 0.1)
        mid.append((w, b))
    p["mid"] = mid
    p["gru_w_ih"] = nrm(next(it), (3 * filters, filters), 0.2)
    p["gru_w_hh"] = nrm(next(it), (3 * filters, filters), 0.2)
    kb = jax.random.split(next(it), 2)
    p["gru_b_ih"] = nrm(kb[0], (3 * filters,), 0.1)
    p["gru_b_hh"] = nrm(kb[1], (3 * filters,), 0.1)

    def bn_params(k):
        kk = jax.random.split(k, 4)
        gamma = 1.0 + 0.1 * jax.random.normal(kk[0], (filters,), jnp.float32)
        beta = 0.1 * jax.random.normal(kk[1], (filters,), jnp.float32)
        rmean = 0.1 * jax.random.normal(kk[2], (filters,), jnp.float32)
        rvar = 0.5 + jax.random.uniform(kk[3], (filters,), dtype=jnp.float32)
        return jnp.stack([gamma, beta, rmean, rvar])

    kbn = jax.random.split(next(it), 2)
    p["bn2"] = bn_params(kbn[0])
    p["bn3"] = bn_params(kbn[1])
    p["dense2_w"] = nrm(next(it), (filters, filters), 0.2)
    p["dense2_b"] = nrm(next(it), (filters,), 0.1)
    return p


def reference_forward(x, params):
    def conv1d(x, w, b=None):
        y = lax.conv_general_dilated(x, w, window_strides=(1,), padding="VALID",
                                     dimension_numbers=("NCH", "OIH", "NCH"))
        if b is not None:
            y = y + b[None, :, None]
        return y

    def ln(x):
        m = jnp.mean(x, axis=(1, 2), keepdims=True)
        v = jnp.mean((x - m) ** 2, axis=(1, 2), keepdims=True)
        return (x - m) / jnp.sqrt(v + LN_EPS)

    x = conv1d(x, params["conv0_w"])
    for (w, b) in params["mid"]:
        x = jnp.maximum(ln(x), 0.0)
        x = conv1d(x, w, b)
        B, C, L = x.shape
        lp = L // 2
        x = x[:, :, :2 * lp].reshape(B, C, lp, 2).max(axis=-1)
    x = jnp.maximum(ln(x), 0.0)
    x = jnp.transpose(x, (0, 2, 1))
    x = jnp.flip(x, axis=1)

    wih, whh = params["gru_w_ih"], params["gru_w_hh"]
    bih, bhh = params["gru_b_ih"], params["gru_b_hh"]
    H = whh.shape[1]
    B, T, _ = x.shape
    h = jnp.zeros((B, H), jnp.float32)
    for t in range(T):
        xt = x[:, t, :]
        gi = xt @ wih.T + bih
        gh = h @ whh.T + bhh
        r = jax.nn.sigmoid(gi[:, :H] + gh[:, :H])
        z = jax.nn.sigmoid(gi[:, H:2 * H] + gh[:, H:2 * H])
        n = jnp.tanh(gi[:, 2 * H:] + r * gh[:, 2 * H:])
        h = (1.0 - z) * n + z * h

    def bn(x, p):
        return (x - p[2]) / jnp.sqrt(p[3] + BN_EPS) * p[0] + p[1]

    x = jnp.maximum(bn(h, params["bn2"]), 0.0)
    x = x @ params["dense2_w"].T + params["dense2_b"]
    x = jnp.maximum(bn(x, params["bn3"]), 0.0)
    return x


# ----------------------------------------------------------------------------

if __name__ == "__main__":
    B, SEQ_DEPTH, L = 2, 6, 64
    FILTERS, KSIZE, NUM_LAYERS = 32, 5, 2

    key = jax.random.PRNGKey(0)
    k_in, k_p = jax.random.split(key)
    inputs = jax.random.normal(k_in, (B, SEQ_DEPTH, L), jnp.float32)
    params = init_params(k_p, seq_depth=SEQ_DEPTH, filters=FILTERS,
                         kernel_size=KSIZE, num_layers=NUM_LAYERS)

    out = saluki_forward(inputs, params)
    out = jax.block_until_ready(out)

    ref = reference_forward(inputs, params)
    assert out.shape == (B, FILTERS), out.shape
    # bf16 matmul operands (f32 accumulation) -> slightly looser tolerance than pure f32.
    assert jnp.allclose(out, ref, rtol=5e-2, atol=5e-2), (out, ref)

    print("KERNEL_OK")
</pallas_src>

<mosaic_0001>
module attributes {stable_mosaic.version = 11 : i64} {
  func.func @conv_stack_kernel(%arg0: i32, %arg1: memref<1x64x6xf32, #tpu.memory_space<vmem>>, %arg2: memref<5x6x32xbf16, #tpu.memory_space<vmem>>, %arg3: memref<2x5x32x32xbf16, #tpu.memory_space<vmem>>, %arg4: memref<2x1x32xf32, #tpu.memory_space<vmem>>, %arg5: memref<32x96xbf16, #tpu.memory_space<vmem>>, %arg6: memref<1x96xf32, #tpu.memory_space<vmem>>, %arg7: memref<1x12x96xf32, #tpu.memory_space<vmem>>, %arg8: memref<56x32xf32, #tpu.memory_space<vmem>>) attributes {dimension_semantics = [#tpu.dimension_semantics<parallel>], iteration_bounds = array<i64: 2>, scalar_prefetch = 0 : i64, scratch_operands = 1 : i64, tpu.core_type = #tpu.core_type<tc>, window_params = [{transform_indices = @transform_0, window_bounds = array<i64: 1, 64, 6>}, {pipeline_mode = #tpu.pipeline_mode<synchronous>, transform_indices = @transform_1, window_bounds = array<i64: 5, 6, 32>}, {pipeline_mode = #tpu.pipeline_mode<synchronous>, transform_indices = @transform_2, window_bounds = array<i64: 2, 5, 32, 32>}, {pipeline_mode = #tpu.pipeline_mode<synchronous>, transform_indices = @transform_3, window_bounds = array<i64: 2, 1, 32>}, {pipeline_mode = #tpu.pipeline_mode<synchronous>, transform_indices = @transform_4, window_bounds = array<i64: 32, 96>}, {pipeline_mode = #tpu.pipeline_mode<synchronous>, transform_indices = @transform_5, window_bounds = array<i64: 1, 96>}, {transform_indices = @transform_6, window_bounds = array<i64: 1, 12, 96>}]} {
    %c0 = arith.constant 0 : index
    %c0_0 = arith.constant 0 : index
    %c0_1 = arith.constant 0 : index
    %0 = vector.load %arg1[%c0, %c0_0, %c0_1] : memref<1x64x6xf32, #tpu.memory_space<vmem>>, vector<1x64x6xf32>
    %1 = vector.shape_cast %0 : vector<1x64x6xf32> to vector<64x6xf32>
    %cst = arith.constant 0.000000e+00 : f32
    %2 = vector.broadcast %cst : f32 to vector<60x32xf32>
    %3 = vector.extract_strided_slice %1 {offsets = [0, 0], sizes = [60, 6], strides = [1, 1]} : vector<64x6xf32> to vector<60x6xf32>
    %4 = arith.truncf %3 : vector<60x6xf32> to vector<60x6xbf16>
    %c0_2 = arith.constant 0 : index
    %c0_3 = arith.constant 0 : index
    %c0_4 = arith.constant 0 : index
    %5 = vector.load %arg2[%c0_2, %c0_3, %c0_4] : memref<5x6x32xbf16, #tpu.memory_space<vmem>>, vector<1x6x32xbf16>
    %6 = vector.shape_cast %5 : vector<1x6x32xbf16> to vector<6x32xbf16>
    %cst_5 = arith.constant dense<0.000000e+00> : vector<60x32xf32>
    %7 = tpu.matmul %4, %6, %cst_5 {dimension_numbers = #tpu.dot_dimension_numbers<[1], [0], [0], [1], [0, 0, 1, 1], [], []>} : vector<60x6xbf16>, vector<6x32xbf16>, vector<60x32xf32> -> vector<60x32xf32>
    %8 = arith.addf %2, %7 : vector<60x32xf32>
    %9 = vector.extract_strided_slice %1 {offsets = [1, 0], sizes = [60, 6], strides = [1, 1]} : vector<64x6xf32> to vector<60x6xf32>
    %10 = arith.truncf %9 : vector<60x6xf32> to vector<60x6xbf16>
    %c1 = arith.constant 1 : index
    %c0_6 = arith.constant 0 : index
    %c0_7 = arith.constant 0 : index
    %11 = vector.load %arg2[%c1, %c0_6, %c0_7] : memref<5x6x32xbf16, #tpu.memory_space<vmem>>, vector<1x6x32xbf16>
    %12 = vector.shape_cast %11 : vector<1x6x32xbf16> to vector<6x32xbf16>
    %cst_8 = arith.constant dense<0.000000e+00> : vector<60x32xf32>
    %13 = tpu.matmul %10, %12, %cst_8 {dimension_numbers = #tpu.dot_dimension_numbers<[1], [0], [0], [1], [0, 0, 1, 1], [], []>} : vector<60x6xbf16>, vector<6x32xbf16>, vector<60x32xf32> -> vector<60x32xf32>
    %14 = arith.addf %8, %13 : vector<60x32xf32>
    %15 = vector.extract_strided_slice %1 {offsets = [2, 0], sizes = [60, 6], strides = [1, 1]} : vector<64x6xf32> to vector<60x6xf32>
    %16 = arith.truncf %15 : vector<60x6xf32> to vector<60x6xbf16>
    %c2 = arith.constant 2 : index
    %c0_9 = arith.constant 0 : index
    %c0_10 = arith.constant 0 : index
    %17 = vector.load %arg2[%c2, %c0_9, %c0_10] : memref<5x6x32xbf16, #tpu.memory_space<vmem>>, vector<1x6x32xbf16>
    %18 = vector.shape_cast %17 : vector<1x6x32xbf16> to vector<6x32xbf16>
    %cst_11 = arith.constant dense<0.000000e+00> : vector<60x32xf32>
    %19 = tpu.matmul %16, %18, %cst_11 {dimension_numbers = #tpu.dot_dimension_numbers<[1], [0], [0], [1], [0, 0, 1, 1], [], []>} : vector<60x6xbf16>, vector<6x32xbf16>, vector<60x32xf32> -> vector<60x32xf32>
    %20 = arith.addf %14, %19 : vector<60x32xf32>
    %21 = vector.extract_strided_slice %1 {offsets = [3, 0], sizes = [60, 6], strides = [1, 1]} : vector<64x6xf32> to vector<60x6xf32>
    %22 = arith.truncf %21 : vector<60x6xf32> to vector<60x6xbf16>
    %c3 = arith.constant 3 : index
    %c0_12 = arith.constant 0 : index
    %c0_13 = arith.constant 0 : index
    %23 = vector.load %arg2[%c3, %c0_12, %c0_13] : memref<5x6x32xbf16, #tpu.memory_space<vmem>>, vector<1x6x32xbf16>
    %24 = vector.shape_cast %23 : vector<1x6x32xbf16> to vector<6x32xbf16>
    %cst_14 = arith.constant dense<0.000000e+00> : vector<60x32xf32>
    %25 = tpu.matmul %22, %24, %cst_14 {dimension_numbers = #tpu.dot_dimension_numbers<[1], [0], [0], [1], [0, 0, 1, 1], [], []>} : vector<60x6xbf16>, vector<6x32xbf16>, vector<60x32xf32> -> vector<60x32xf32>
    %26 = arith.addf %20, %25 : vector<60x32xf32>
    %27 = vector.extract_strided_slice %1 {offsets = [4, 0], sizes = [60, 6], strides = [1, 1]} : vector<64x6xf32> to vector<60x6xf32>
    %28 = arith.truncf %27 : vector<60x6xf32> to vector<60x6xbf16>
    %c4 = arith.constant 4 : index
    %c0_15 = arith.constant 0 : index
    %c0_16 = arith.constant 0 : index
    %29 = vector.load %arg2[%c4, %c0_15, %c0_16] : memref<5x6x32xbf16, #tpu.memory_space<vmem>>, vector<1x6x32xbf16>
    %30 = vector.shape_cast %29 : vector<1x6x32xbf16> to vector<6x32xbf16>
    %cst_17 = arith.constant dense<0.000000e+00> : vector<60x32xf32>
    %31 = tpu.matmul %28, %30, %cst_17 {dimension_numbers = #tpu.dot_dimension_numbers<[1], [0], [0], [1], [0, 0, 1, 1], [], []>} : vector<60x6xbf16>, vector<6x32xbf16>, vector<60x32xf32> -> vector<60x32xf32>
    %32 = arith.addf %26, %31 : vector<60x32xf32>
    %33 = vector.shape_cast %32 : vector<60x32xf32> to vector<1x60x32xf32>
    %cst_18 = arith.constant dense<0.000000e+00> : vector<1xf32>
    %34 = vector.multi_reduction <add>, %33, %cst_18 [1, 2] : vector<1x60x32xf32> to vector<1xf32>
    %35 = vector.shape_cast %34 : vector<1xf32> to vector<1x1x1xf32>
    %36 = vector.extract %35[0, 0, 0] : f32 from vector<1x1x1xf32>
    %37 = arith.mulf %32, %32 : vector<60x32xf32>
    %38 = vector.shape_cast %37 : vector<60x32xf32> to vector<1x60x32xf32>
    %cst_19 = arith.constant dense<0.000000e+00> : vector<1xf32>
    %39 = vector.multi_reduction <add>, %38, %cst_19 [1, 2] : vector<1x60x32xf32> to vector<1xf32>
    %40 = vector.shape_cast %39 : vector<1xf32> to vector<1x1x1xf32>
    %41 = vector.extract %40[0, 0, 0] : f32 from vector<1x1x1xf32>
    %cst_20 = arith.constant 1.920000e+03 : f32
    %42 = arith.divf %36, %cst_20 : f32
    %cst_21 = arith.constant 1.920000e+03 : f32
    %43 = arith.divf %41, %cst_21 : f32
    %44 = arith.mulf %42, %42 : f32
    %45 = arith.subf %43, %44 : f32
    %46 = vector.broadcast %42 : f32 to vector<60x32xf32>
    %47 = arith.subf %32, %46 : vector<60x32xf32>
    %cst_22 = arith.constant 7.000000e-03 : f32
    %48 = arith.addf %45, %cst_22 : f32
    %49 = math.rsqrt %48 : f32
    %50 = vector.broadcast %49 : f32 to vector<60x32xf32>
    %51 = arith.mulf %47, %50 : vector<60x32xf32>
    %cst_23 = arith.constant 0.000000e+00 : f32
    %52 = vector.broadcast %cst_23 : f32 to vector<60x32xf32>
    %53 = arith.maximumf %51, %52 : vector<60x32xf32>
    %cst_24 = arith.constant 0.000000e+00 : f32
    %54 = vector.broadcast %cst_24 : f32 to vector<56x32xf32>
    %55 = vector.extract_strided_slice %53 {offsets = [0, 0], sizes = [56, 32], strides = [1, 1]} : vector<60x32xf32> to vector<56x32xf32>
    %56 = arith.truncf %55 : vector<56x32xf32> to vector<56x32xbf16>
    %c0_25 = arith.constant 0 : index
    %c0_26 = arith.constant 0 : index
    %c0_27 = arith.constant 0 : index
    %c0_28 = arith.constant 0 : index
    %57 = vector.load %arg3[%c0_25, %c0_26, %c0_27, %c0_28] : memref<2x5x32x32xbf16, #tpu.memory_space<vmem>>, vector<1x1x32x32xbf16>
    %58 = vector.shape_cast %57 : vector<1x1x32x32xbf16> to vector<32x32xbf16>
    %cst_29 = arith.constant dense<0.000000e+00> : vector<56x32xf32>
    %59 = tpu.matmul %56, %58, %cst_29 {dimension_numbers = #tpu.dot_dimension_numbers<[1], [0], [0], [1], [0, 0, 1, 1], [], []>} : vector<56x32xbf16>, vector<32x32xbf16>, vector<56x32xf32> -> vector<56x32xf32>
    %60 = arith.addf %54, %59 : vector<56x32xf32>
    %61 = vector.extract_strided_slice %53 {offsets = [1, 0], sizes = [56, 32], strides = [1, 1]} : vector<60x32xf32> to vector<56x32xf32>
    %62 = arith.truncf %61 : vector<56x32xf32> to vector<56x32xbf16>
    %c0_30 = arith.constant 0 : index
    %c1_31 = arith.constant 1 : index
    %c0_32 = arith.constant 0 : index
    %c0_33 = arith.constant 0 : index
    %63 = vector.load %arg3[%c0_30, %c1_31, %c0_32, %c0_33] : memref<2x5x32x32xbf16, #tpu.memory_space<vmem>>, vector<1x1x32x32xbf16>
    %64 = vector.shape_cast %63 : vector<1x1x32x32xbf16> to vector<32x32xbf16>
    %cst_34 = arith.constant dense<0.000000e+00> : vector<56x32xf32>
    %65 = tpu.matmul %62, %64, %cst_34 {dimension_numbers = #tpu.dot_dimension_numbers<[1], [0], [0], [1], [0, 0, 1, 1], [], []>} : vector<56x32xbf16>, vector<32x32xbf16>, vector<56x32xf32> -> vector<56x32xf32>
    %66 = arith.addf %60, %65 : vector<56x32xf32>
    %67 = vector.extract_strided_slice %53 {offsets = [2, 0], sizes = [56, 32], strides = [1, 1]} : vector<60x32xf32> to vector<56x32xf32>
    %68 = arith.truncf %67 : vector<56x32xf32> to vector<56x32xbf16>
    %c0_35 = arith.constant 0 : index
    %c2_36 = arith.constant 2 : index
    %c0_37 = arith.constant 0 : index
    %c0_38 = arith.constant 0 : index
    %69 = vector.load %arg3[%c0_35, %c2_36, %c0_37, %c0_38] : memref<2x5x32x32xbf16, #tpu.memory_space<vmem>>, vector<1x1x32x32xbf16>
    %70 = vector.shape_cast %69 : vector<1x1x32x32xbf16> to vector<32x32xbf16>
    %cst_39 = arith.constant dense<0.000000e+00> : vector<56x32xf32>
    %71 = tpu.matmul %68, %70, %cst_39 {dimension_numbers = #tpu.dot_dimension_numbers<[1], [0], [0], [1], [0, 0, 1, 1], [], []>} : vector<56x32xbf16>, vector<32x32xbf16>, vector<56x32xf32> -> vector<56x32xf32>
    %72 = arith.addf %66, %71 : vector<56x32xf32>
    %73 = vector.extract_strided_slice %53 {offsets = [3, 0], sizes = [56, 32], strides = [1, 1]} : vector<60x32xf32> to vector<56x32xf32>
    %74 = arith.truncf %73 : vector<56x32xf32> to vector<56x32xbf16>
    %c0_40 = arith.constant 0 : index
    %c3_41 = arith.constant 3 : index
    %c0_42 = arith.constant 0 : index
    %c0_43 = arith.constant 0 : index
    %75 = vector.load %arg3[%c0_40, %c3_41, %c0_42, %c0_43] : memref<2x5x32x32xbf16, #tpu.memory_space<vmem>>, vector<1x1x32x32xbf16>
    %76 = vector.shape_cast %75 : vector<1x1x32x32xbf16> to vector<32x32xbf16>
    %cst_44 = arith.constant dense<0.000000e+00> : vector<56x32xf32>
    %77 = tpu.matmul %74, %76, %cst_44 {dimension_numbers = #tpu.dot_dimension_numbers<[1], [0], [0], [1], [0, 0, 1, 1], [], []>} : vector<56x32xbf16>, vector<32x32xbf16>, vector<56x32xf32> -> vector<56x32xf32>
    %78 = arith.addf %72, %77 : vector<56x32xf32>
    %79 = vector.extract_strided_slice %53 {offsets = [4, 0], sizes = [56, 32], strides = [1, 1]} : vector<60x32xf32> to vector<56x32xf32>
    %80 = arith.truncf %79 : vector<56x32xf32> to vector<56x32xbf16>
    %c0_45 = arith.constant 0 : index
    %c4_46 = arith.constant 4 : index
    %c0_47 = arith.constant 0 : index
    %c0_48 = arith.constant 0 : index
    %81 = vector.load %arg3[%c0_45, %c4_46, %c0_47, %c0_48] : memref<2x5x32x32xbf16, #tpu.memory_space<vmem>>, vector<1x1x32x32xbf16>
    %82 = vector.shape_cast %81 : vector<1x1x32x32xbf16> to vector<32x32xbf16>
    %cst_49 = arith.constant dense<0.000000e+00> : vector<56x32xf32>
    %83 = tpu.matmul %80, %82, %cst_49 {dimension_numbers = #tpu.dot_dimension_numbers<[1], [0], [0], [1], [0, 0, 1, 1], [], []>} : vector<56x32xbf16>, vector<32x32xbf16>, vector<56x32xf32> -> vector<56x32xf32>
    %84 = arith.addf %78, %83 : vector<56x32xf32>
    %c0_50 = arith.constant 0 : index
    %c0_51 = arith.constant 0 : index
    %c0_52 = arith.constant 0 : index
    %85 = vector.load %arg4[%c0_50, %c0_51, %c0_52] : memref<2x1x32xf32, #tpu.memory_space<vmem>>, vector<1x1x32xf32>
    %86 = vector.shape_cast %85 : vector<1x1x32xf32> to vector<1x32xf32>
    %87 = vector.broadcast %86 : vector<1x32xf32> to vector<56x32xf32>
    %88 = arith.addf %84, %87 : vector<56x32xf32>
    %c0_53 = arith.constant 0 : index
    %c0_54 = arith.constant 0 : index
    %89 = vector.load %arg8[%c0_53, %c0_54] : memref<56x32xf32, #tpu.memory_space<vmem>>, vector<56x32xf32>
    tpu.vector_store %arg8[%c0_53, %c0_54], %88 {strides = array<i32>} : memref<56x32xf32, #tpu.memory_space<vmem>>, vector<56x32xf32>,
    %c0_55 = arith.constant 0 : index
    %c0_56 = arith.constant 0 : index
    %90 = tpu.strided_load %arg8[%c0_55, %c0_56] {strides = array<i32: 2, 1>} : memref<56x32xf32, #tpu.memory_space<vmem>>, vector<28x32xf32>
    %c1_57 = arith.constant 1 : index
    %c0_58 = arith.constant 0 : index
    %91 = tpu.strided_load %arg8[%c1_57, %c0_58] {strides = array<i32: 2, 1>} : memref<56x32xf32, #tpu.memory_space<vmem>>, vector<28x32xf32>
    %92 = arith.maximumf %90, %91 : vector<28x32xf32>
    %93 = vector.shape_cast %92 : vector<28x32xf32> to vector<1x28x32xf32>
    %cst_59 = arith.constant dense<0.000000e+00> : vector<1xf32>
    %94 = vector.multi_reduction <add>, %93, %cst_59 [1, 2] : vector<1x28x32xf32> to vector<1xf32>
    %95 = vector.shape_cast %94 : vector<1xf32> to vector<1x1x1xf32>
    %96 = vector.extract %95[0, 0, 0] : f32 from vector<1x1x1xf32>
    %97 = arith.mulf %92, %92 : vector<28x32xf32>
    %98 = vector.shape_cast %97 : vector<28x32xf32> to vector<1x28x32xf32>
    %cst_60 = arith.constant dense<0.000000e+00> : vector<1xf32>
    %99 = vector.multi_reduction <add>, %98, %cst_60 [1, 2] : vector<1x28x32xf32> to vector<1xf32>
    %100 = vector.shape_cast %99 : vector<1xf32> to vector<1x1x1xf32>
    %101 = vector.extract %100[0, 0, 0] : f32 from vector<1x1x1xf32>
    %cst_61 = arith.constant 8.960000e+02 : f32
    %102 = arith.divf %96, %cst_61 : f32
    %cst_62 = arith.constant 8.960000e+02 : f32
    %103 = arith.divf %101, %cst_62 : f32
    %104 = arith.mulf %102, %102 : f32
    %105 = arith.subf %103, %104 : f32
    %106 = vector.broadcast %102 : f32 to vector<28x32xf32>
    %107 = arith.subf %92, %106 : vector<28x32xf32>
    %cst_63 = arith.constant 7.000000e-03 : f32
    %108 = arith.addf %105, %cst_63 : f32
    %109 = math.rsqrt %108 : f32
    %110 = vector.broadcast %109 : f32 to vector<28x32xf32>
    %111 = arith.mulf %107, %110 : vector<28x32xf32>
    %cst_64 = arith.constant 0.000000e+00 : f32
    %112 = vector.broadcast %cst_64 : f32 to vector<28x32xf32>
    %113 = arith.maximumf %111, %112 : vector<28x32xf32>
    %cst_65 = arith.constant 0.000000e+00 : f32
    %114 = vector.broadcast %cst_65 : f32 to vector<24x32xf32>
    %115 = vector.extract_strided_slice %113 {offsets = [0, 0], sizes = [24, 32], strides = [1, 1]} : vector<28x32xf32> to vector<24x32xf32>
    %116 = arith.truncf %115 : vector<24x32xf32> to vector<24x32xbf16>
    %c1_66 = arith.constant 1 : index
    %c0_67 = arith.constant 0 : index
    %c0_68 = arith.constant 0 : index
    %c0_69 = arith.constant 0 : index
    %117 = vector.load %arg3[%c1_66, %c0_67, %c0_68, %c0_69] : memref<2x5x32x32xbf16, #tpu.memory_space<vmem>>, vector<1x1x32x32xbf16>
    %118 = vector.shape_cast %117 : vector<1x1x32x32xbf16> to vector<32x32xbf16>
    %cst_70 = arith.constant dense<0.000000e+00> : vector<24x32xf32>
    %119 = tpu.matmul %116, %118, %cst_70 {dimension_numbers = #tpu.dot_dimension_numbers<[1], [0], [0], [1], [0, 0, 1, 1], [], []>} : vector<24x32xbf16>, vector<32x32xbf16>, vector<24x32xf32> -> vector<24x32xf32>
    %120 = arith.addf %114, %119 : vector<24x32xf32>
    %121 = vector.extract_strided_slice %113 {offsets = [1, 0], sizes = [24, 32], strides = [1, 1]} : vector<28x32xf32> to vector<24x32xf32>
    %122 = arith.truncf %121 : vector<24x32xf32> to vector<24x32xbf16>
    %c1_71 = arith.constant 1 : index
    %c1_72 = arith.constant 1 : index
    %c0_73 = arith.constant 0 : index
    %c0_74 = arith.constant 0 : index
    %123 = vector.load %arg3[%c1_71, %c1_72, %c0_73, %c0_74] : memref<2x5x32x32xbf16, #tpu.memory_space<vmem>>, vector<1x1x32x32xbf16>
    %124 = vector.shape_cast %123 : vector<1x1x32x32xbf16> to vector<32x32xbf16>
    %cst_75 = arith.constant dense<0.000000e+00> : vector<24x32xf32>
    %125 = tpu.matmul %122, %124, %cst_75 {dimension_numbers = #tpu.dot_dimension_numbers<[1], [0], [0], [1], [0, 0, 1, 1], [], []>} : vector<24x32xbf16>, vector<32x32xbf16>, vector<24x32xf32> -> vector<24x32xf32>
    %126 = arith.addf %120, %125 : vector<24x32xf32>
    %127 = vector.extract_strided_slice %113 {offsets = [2, 0], sizes = [24, 32], strides = [1, 1]} : vector<28x32xf32> to vector<24x32xf32>
    %128 = arith.truncf %127 : vector<24x32xf32> to vector<24x32xbf16>
    %c1_76 = arith.constant 1 : index
    %c2_77 = arith.constant 2 : index
    %c0_78 = arith.constant 0 : index
    %c0_79 = arith.constant 0 : index
    %129 = vector.load %arg3[%c1_76, %c2_77, %c0_78, %c0_79] : memref<2x5x32x32xbf16, #tpu.memory_space<vmem>>, vector<1x1x32x32xbf16>
    %130 = vector.shape_cast %129 : vector<1x1x32x32xbf16> to vector<32x32xbf16>
    %cst_80 = arith.constant dense<0.000000e+00> : vector<24x32xf32>
    %131 = tpu.matmul %128, %130, %cst_80 {dimension_numbers = #tpu.dot_dimension_numbers<[1], [0], [0], [1], [0, 0, 1, 1], [], []>} : vector<24x32xbf16>, vector<32x32xbf16>, vector<24x32xf32> -> vector<24x32xf32>
    %132 = arith.addf %126, %131 : vector<24x32xf32>
    %133 = vector.extract_strided_slice %113 {offsets = [3, 0], sizes = [24, 32], strides = [1, 1]} : vector<28x32xf32> to vector<24x32xf32>
    %134 = arith.truncf %133 : vector<24x32xf32> to vector<24x32xbf16>
    %c1_81 = arith.constant 1 : index
    %c3_82 = arith.constant 3 : index
    %c0_83 = arith.constant 0 : index
    %c0_84 = arith.constant 0 : index
    %135 = vector.load %arg3[%c1_81, %c3_82, %c0_83, %c0_84] : memref<2x5x32x32xbf16, #tpu.memory_space<vmem>>, vector<1x1x32x32xbf16>
    %136 = vector.shape_cast %135 : vector<1x1x32x32xbf16> to vector<32x32xbf16>
    %cst_85 = arith.constant dense<0.000000e+00> : vector<24x32xf32>
    %137 = tpu.matmul %134, %136, %cst_85 {dimension_numbers = #tpu.dot_dimension_numbers<[1], [0], [0], [1], [0, 0, 1, 1], [], []>} : vector<24x32xbf16>, vector<32x32xbf16>, vector<24x32xf32> -> vector<24x32xf32>
    %138 = arith.addf %132, %137 : vector<24x32xf32>
    %139 = vector.extract_strided_slice %113 {offsets = [4, 0], sizes = [24, 32], strides = [1, 1]} : vector<28x32xf32> to vector<24x32xf32>
    %140 = arith.truncf %139 : vector<24x32xf32> to vector<24x32xbf16>
    %c1_86 = arith.constant 1 : index
    %c4_87 = arith.constant 4 : index
    %c0_88 = arith.constant 0 : index
    %c0_89 = arith.constant 0 : index
    %141 = vector.load %arg3[%c1_86, %c4_87, %c0_88, %c0_89] : memref<2x5x32x32xbf16, #tpu.memory_space<vmem>>, vector<1x1x32x32xbf16>
    %142 = vector.shape_cast %141 : vector<1x1x32x32xbf16> to vector<32x32xbf16>
    %cst_90 = arith.constant dense<0.000000e+00> : vector<24x32xf32>
    %143 = tpu.matmul %140, %142, %cst_90 {dimension_numbers = #tpu.dot_dimension_numbers<[1], [0], [0], [1], [0, 0, 1, 1], [], []>} : vector<24x32xbf16>, vector<32x32xbf16>, vector<24x32xf32> -> vector<24x32xf32>
    %144 = arith.addf %138, %143 : vector<24x32xf32>
    %c1_91 = arith.constant 1 : index
    %c0_92 = arith.constant 0 : index
    %c0_93 = arith.constant 0 : index
    %145 = vector.load %arg4[%c1_91, %c0_92, %c0_93] : memref<2x1x32xf32, #tpu.memory_space<vmem>>, vector<1x1x32xf32>
    %146 = vector.shape_cast %145 : vector<1x1x32xf32> to vector<1x32xf32>
    %147 = vector.broadcast %146 : vector<1x32xf32> to vector<24x32xf32>
    %148 = arith.addf %144, %147 : vector<24x32xf32>
    %c0_94 = arith.constant 0 : index
    %c0_95 = arith.constant 0 : index
    %149 = vector.load %arg8[%c0_94, %c0_95] : memref<56x32xf32, #tpu.memory_space<vmem>>, vector<24x32xf32>
    tpu.vector_store %arg8[%c0_94, %c0_95], %148 {strides = array<i32>} : memref<56x32xf32, #tpu.memory_space<vmem>>, vector<24x32xf32>,
    %c0_96 = arith.constant 0 : index
    %c0_97 = arith.constant 0 : index
    %150 = tpu.strided_load %arg8[%c0_96, %c0_97] {strides = array<i32: 2, 1>} : memref<56x32xf32, #tpu.memory_space<vmem>>, vector<12x32xf32>
    %c1_98 = arith.constant 1 : index
    %c0_99 = arith.constant 0 : index
    %151 = tpu.strided_load %arg8[%c1_98, %c0_99] {strides = array<i32: 2, 1>} : memref<56x32xf32, #tpu.memory_space<vmem>>, vector<12x32xf32>
    %152 = arith.maximumf %150, %151 : vector<12x32xf32>
    %153 = vector.shape_cast %152 : vector<12x32xf32> to vector<1x12x32xf32>
    %cst_100 = arith.constant dense<0.000000e+00> : vector<1xf32>
    %154 = vector.multi_reduction <add>, %153, %cst_100 [1, 2] : vector<1x12x32xf32> to vector<1xf32>
    %155 = vector.shape_cast %154 : vector<1xf32> to vector<1x1x1xf32>
    %156 = vector.extract %155[0, 0, 0] : f32 from vector<1x1x1xf32>
    %157 = arith.mulf %152, %152 : vector<12x32xf32>
    %158 = vector.shape_cast %157 : vector<12x32xf32> to vector<1x12x32xf32>
    %cst_101 = arith.constant dense<0.000000e+00> : vector<1xf32>
    %159 = vector.multi_reduction <add>, %158, %cst_101 [1, 2] : vector<1x12x32xf32> to vector<1xf32>
    %160 = vector.shape_cast %159 : vector<1xf32> to vector<1x1x1xf32>
    %161 = vector.extract %160[0, 0, 0] : f32 from vector<1x1x1xf32>
    %cst_102 = arith.constant 3.840000e+02 : f32
    %162 = arith.divf %156, %cst_102 : f32
    %cst_103 = arith.constant 3.840000e+02 : f32
    %163 = arith.divf %161, %cst_103 : f32
    %164 = arith.mulf %162, %162 : f32
    %165 = arith.subf %163, %164 : f32
    %166 = vector.broadcast %162 : f32 to vector<12x32xf32>
    %167 = arith.subf %152, %166 : vector<12x32xf32>
    %cst_104 = arith.constant 7.000000e-03 : f32
    %168 = arith.addf %165, %cst_104 : f32
    %169 = math.rsqrt %168 : f32
    %170 = vector.broadcast %169 : f32 to vector<12x32xf32>
    %171 = arith.mulf %167, %170 : vector<12x32xf32>
    %cst_105 = arith.constant 0.000000e+00 : f32
    %172 = vector.broadcast %cst_105 : f32 to vector<12x32xf32>
    %173 = arith.maximumf %171, %172 : vector<12x32xf32>
    %174 = arith.truncf %173 : vector<12x32xf32> to vector<12x32xbf16>
    %c0_106 = arith.constant 0 : index
    %c0_107 = arith.constant 0 : index
    %175 = vector.load %arg5[%c0_106, %c0_107] : memref<32x96xbf16, #tpu.memory_space<vmem>>, vector<32x96xbf16>
    %cst_108 = arith.constant dense<0.000000e+00> : vector<12x96xf32>
    %176 = tpu.matmul %174, %175, %cst_108 {dimension_numbers = #tpu.dot_dimension_numbers<[1], [0], [0], [1], [0, 0, 1, 1], [], []>} : vector<12x32xbf16>, vector<32x96xbf16>, vector<12x96xf32> -> vector<12x96xf32>
    %c0_109 = arith.constant 0 : index
    %c0_110 = arith.constant 0 : index
    %177 = vector.load %arg6[%c0_109, %c0_110] : memref<1x96xf32, #tpu.memory_space<vmem>>, vector<1x96xf32>
    %178 = vector.broadcast %177 : vector<1x96xf32> to vector<12x96xf32>
    %179 = arith.addf %176, %178 : vector<12x96xf32>
    %c0_111 = arith.constant 0 : index
    %c0_112 = arith.constant 0 : index
    %c0_113 = arith.constant 0 : index
    %180 = vector.load %arg7[%c0_111, %c0_112, %c0_113] : memref<1x12x96xf32, #tpu.memory_space<vmem>>, vector<1x12x96xf32>
    %181 = vector.shape_cast %180 : vector<1x12x96xf32> to vector<12x96xf32>
    %182 = vector.shape_cast %179 : vector<12x96xf32> to vector<1x12x96xf32>
    tpu.vector_store %arg7[%c0_111, %c0_112, %c0_113], %182 {strides = array<i32>} : memref<1x12x96xf32, #tpu.memory_space<vmem>>, vector<1x12x96xf32>,
    return
  }
  func.func @transform_0(%arg0: i32) -> (i32, i32, i32) {
    %c0_i32 = arith.constant 0 : i32
    %c0_i32_0 = arith.constant 0 : i32
    %c0_i32_1 = arith.constant 0 : i32
    return %arg0, %c0_i32, %c0_i32_0 : i32, i32, i32
  }
  func.func @transform_1(%arg0: i32) -> (i32, i32, i32) {
    %c0_i32 = arith.constant 0 : i32
    %c0_i32_0 = arith.constant 0 : i32
    %c0_i32_1 = arith.constant 0 : i32
    %c0_i32_2 = arith.constant 0 : i32
    return %c0_i32, %c0_i32_0, %c0_i32_1 : i32, i32, i32
  }
  func.func @transform_2(%arg0: i32) -> (i32, i32, i32, i32) {
    %c0_i32 = arith.constant 0 : i32
    %c0_i32_0 = arith.constant 0 : i32
    %c0_i32_1 = arith.constant 0 : i32
    %c0_i32_2 = arith.constant 0 : i32
    %c0_i32_3 = arith.constant 0 : i32
    return %c0_i32, %c0_i32_0, %c0_i32_1, %c0_i32_2 : i32, i32, i32, i32
  }
  func.func @transform_3(%arg0: i32) -> (i32, i32, i32) {
    %c0_i32 = arith.constant 0 : i32
    %c0_i32_0 = arith.constant 0 : i32
    %c0_i32_1 = arith.constant 0 : i32
    %c0_i32_2 = arith.constant 0 : i32
    return %c0_i32, %c0_i32_0, %c0_i32_1 : i32, i32, i32
  }
  func.func @transform_4(%arg0: i32) -> (i32, i32) {
    %c0_i32 = arith.constant 0 : i32
    %c0_i32_0 = arith.constant 0 : i32
    %c0_i32_1 = arith.constant 0 : i32
    return %c0_i32, %c0_i32_0 : i32, i32
  }
  func.func @transform_5(%arg0: i32) -> (i32, i32) {
    %c0_i32 = arith.constant 0 : i32
    %c0_i32_0 = arith.constant 0 : i32
    %c0_i32_1 = arith.constant 0 : i32
    return %c0_i32, %c0_i32_0 : i32, i32
  }
  func.func @transform_6(%arg0: i32) -> (i32, i32, i32) {
    %c0_i32 = arith.constant 0 : i32
    %c0_i32_0 = arith.constant 0 : i32
    %c0_i32_1 = arith.constant 0 : i32
    return %arg0, %c0_i32, %c0_i32_0 : i32, i32, i32
  }
}

module attributes {stable_mosaic.version = 11 : i64} {
  func.func @gru_head_kernel(%arg0: i32, %arg1: memref<12x2x96xf32, #tpu.memory_space<vmem>>, %arg2: memref<32x96xbf16, #tpu.memory_space<vmem>>, %arg3: memref<1x32xf32, #tpu.memory_space<vmem>>, %arg4: memref<32x32xbf16, #tpu.memory_space<vmem>>, %arg5: memref<4x32xf32, #tpu.memory_space<vmem>>, %arg6: memref<2x32xf32, #tpu.memory_space<vmem>>) attributes {dimension_semantics = [#tpu.dimension_semantics<arbitrary>], iteration_bounds = array<i64: 1>, scalar_prefetch = 0 : i64, scratch_operands = 0 : i64, tpu.core_type = #tpu.core_type<tc>, window_params = [{pipeline_mode = #tpu.pipeline_mode<synchronous>, transform_indices = @transform_0, window_bounds = array<i64: 12, 2, 96>}, {pipeline_mode = #tpu.pipeline_mode<synchronous>, transform_indices = @transform_1, window_bounds = array<i64: 32, 96>}, {pipeline_mode = #tpu.pipeline_mode<synchronous>, transform_indices = @transform_2, window_bounds = array<i64: 1, 32>}, {pipeline_mode = #tpu.pipeline_mode<synchronous>, transform_indices = @transform_3, window_bounds = array<i64: 32, 32>}, {pipeline_mode = #tpu.pipeline_mode<synchronous>, transform_indices = @transform_4, window_bounds = array<i64: 4, 32>}, {pipeline_mode = #tpu.pipeline_mode<synchronous>, transform_indices = @transform_5, window_bounds = array<i64: 2, 32>}]} {
    %c0 = arith.constant 0 : index
    %c0_0 = arith.constant 0 : index
    %0 = vector.load %arg2[%c0, %c0_0] : memref<32x96xbf16, #tpu.memory_space<vmem>>, vector<32x96xbf16>
    %c0_1 = arith.constant 0 : index
    %c0_2 = arith.constant 0 : index
    %1 = vector.load %arg3[%c0_1, %c0_2] : memref<1x32xf32, #tpu.memory_space<vmem>>, vector<1x32xf32>
    %cst = arith.constant 0.000000e+00 : f32
    %2 = vector.broadcast %cst : f32 to vector<2x32xf32>
    %c0_i32 = arith.constant 0 : i32
    %c12_i32 = arith.constant 12 : i32
    %3 = arith.addi %c0_i32, %c12_i32 : i32
    %c1_i32 = arith.constant 1 : i32
    %4 = scf.for %arg7 = %c0_i32 to %3 step %c1_i32 iter_args(%arg8 = %2) -> (vector<2x32xf32>)  : i32 {
      %c11_i32 = arith.constant 11 : i32
      %26 = arith.subi %c11_i32, %arg7 : i32
      %27 = arith.index_cast %26 : i32 to index
      %c0_13 = arith.constant 0 : index
      %c0_14 = arith.constant 0 : index
      %28 = vector.load %arg1[%27, %c0_13, %c0_14] : memref<12x2x96xf32, #tpu.memory_space<vmem>>, vector<1x2x96xf32>
      %29 = vector.shape_cast %28 : vector<1x2x96xf32> to vector<2x96xf32>
      %30 = arith.truncf %arg8 : vector<2x32xf32> to vector<2x32xbf16>
      %cst_15 = arith.constant dense<0.000000e+00> : vector<2x96xf32>
      %31 = tpu.matmul %30, %0, %cst_15 {dimension_numbers = #tpu.dot_dimension_numbers<[1], [0], [0], [1], [0, 0, 1, 1], [], []>} : vector<2x32xbf16>, vector<32x96xbf16>, vector<2x96xf32> -> vector<2x96xf32>
      %32 = vector.extract_strided_slice %29 {offsets = [0, 0], sizes = [2, 32], strides = [1, 1]} : vector<2x96xf32> to vector<2x32xf32>
      %33 = vector.extract_strided_slice %31 {offsets = [0, 0], sizes = [2, 32], strides = [1, 1]} : vector<2x96xf32> to vector<2x32xf32>
      %34 = arith.addf %32, %33 : vector<2x32xf32>
      %35 = arith.negf %34 : vector<2x32xf32>
      %36 = math.exp %35 : vector<2x32xf32>
      %cst_16 = arith.constant 1.000000e+00 : f32
      %37 = vector.broadcast %cst_16 : f32 to vector<2x32xf32>
      %38 = arith.addf %37, %36 : vector<2x32xf32>
      %39 = arith.divf %37, %38 : vector<2x32xf32>
      %40 = vector.extract_strided_slice %29 {offsets = [0, 32], sizes = [2, 32], strides = [1, 1]} : vector<2x96xf32> to vector<2x32xf32>
      %41 = vector.extract_strided_slice %31 {offsets = [0, 32], sizes = [2, 32], strides = [1, 1]} : vector<2x96xf32> to vector<2x32xf32>
      %42 = arith.addf %40, %41 : vector<2x32xf32>
      %43 = arith.negf %42 : vector<2x32xf32>
      %44 = math.exp %43 : vector<2x32xf32>
      %cst_17 = arith.constant 1.000000e+00 : f32
      %45 = vector.broadcast %cst_17 : f32 to vector<2x32xf32>
      %46 = arith.addf %45, %44 : vector<2x32xf32>
      %47 = arith.divf %45, %46 : vector<2x32xf32>
      %48 = vector.extract_strided_slice %29 {offsets = [0, 64], sizes = [2, 32], strides = [1, 1]} : vector<2x96xf32> to vector<2x32xf32>
      %49 = vector.extract_strided_slice %31 {offsets = [0, 64], sizes = [2, 32], strides = [1, 1]} : vector<2x96xf32> to vector<2x32xf32>
      %50 = vector.broadcast %1 : vector<1x32xf32> to vector<2x32xf32>
      %51 = arith.addf %49, %50 : vector<2x32xf32>
      %52 = arith.mulf %39, %51 : vector<2x32xf32>
      %53 = arith.addf %48, %52 : vector<2x32xf32>
      %54 = math.tanh %53 : vector<2x32xf32>
      %cst_18 = arith.constant 1.000000e+00 : f32
      %55 = vector.broadcast %cst_18 : f32 to vector<2x32xf32>
      %56 = arith.subf %55, %47 : vector<2x32xf32>
      %57 = arith.mulf %56, %54 : vector<2x32xf32>
      %58 = arith.mulf %47, %arg8 : vector<2x32xf32>
      %59 = arith.addf %57, %58 : vector<2x32xf32>
      scf.yield %59 : vector<2x32xf32>
    }
    %c12_i32_3 = arith.constant 12 : i32
    %c0_4 = arith.constant 0 : index
    %c0_5 = arith.constant 0 : index
    %5 = vector.load %arg5[%c0_4, %c0_5] : memref<4x32xf32, #tpu.memory_space<vmem>>, vector<4x32xf32>
    %6 = vector.extract_strided_slice %5 {offsets = [0, 0], sizes = [1, 32], strides = [1, 1]} : vector<4x32xf32> to vector<1x32xf32>
    %7 = vector.broadcast %6 : vector<1x32xf32> to vector<2x32xf32>
    %8 = arith.mulf %4, %7 : vector<2x32xf32>
    %9 = vector.extract_strided_slice %5 {offsets = [1, 0], sizes = [1, 32], strides = [1, 1]} : vector<4x32xf32> to vector<1x32xf32>
    %10 = vector.broadcast %9 : vector<1x32xf32> to vector<2x32xf32>
    %11 = arith.addf %8, %10 : vector<2x32xf32>
    %cst_6 = arith.constant 0.000000e+00 : f32
    %12 = vector.broadcast %cst_6 : f32 to vector<2x32xf32>
    %13 = arith.maximumf %11, %12 : vector<2x32xf32>
    %14 = arith.truncf %13 : vector<2x32xf32> to vector<2x32xbf16>
    %c0_7 = arith.constant 0 : index
    %c0_8 = arith.constant 0 : index
    %15 = vector.load %arg4[%c0_7, %c0_8] : memref<32x32xbf16, #tpu.memory_space<vmem>>, vector<32x32xbf16>
    %cst_9 = arith.constant dense<0.000000e+00> : vector<2x32xf32>
    %16 = tpu.matmul %14, %15, %cst_9 {dimension_numbers = #tpu.dot_dimension_numbers<[1], [0], [0], [1], [0, 0, 1, 1], [], []>} : vector<2x32xbf16>, vector<32x32xbf16>, vector<2x32xf32> -> vector<2x32xf32>
    %17 = vector.extract_strided_slice %5 {offsets = [2, 0], sizes = [1, 32], strides = [1, 1]} : vector<4x32xf32> to vector<1x32xf32>
    %18 = vector.broadcast %17 : vector<1x32xf32> to vector<2x32xf32>
    %19 = arith.mulf %16, %18 : vector<2x32xf32>
    %20 = vector.extract_strided_slice %5 {offsets = [3, 0], sizes = [1, 32], strides = [1, 1]} : vector<4x32xf32> to vector<1x32xf32>
    %21 = vector.broadcast %20 : vector<1x32xf32> to vector<2x32xf32>
    %22 = arith.addf %19, %21 : vector<2x32xf32>
    %cst_10 = arith.constant 0.000000e+00 : f32
    %23 = vector.broadcast %cst_10 : f32 to vector<2x32xf32>
    %24 = arith.maximumf %22, %23 : vector<2x32xf32>
    %c0_11 = arith.constant 0 : index
    %c0_12 = arith.constant 0 : index
    %25 = vector.load %arg6[%c0_11, %c0_12] : memref<2x32xf32, #tpu.memory_space<vmem>>, vector<2x32xf32>
    tpu.vector_store %arg6[%c0_11, %c0_12], %24 {strides = array<i32>} : memref<2x32xf32, #tpu.memory_space<vmem>>, vector<2x32xf32>,
    return
  }
  func.func @transform_0(%arg0: i32) -> (i32, i32, i32) {
    %c0_i32 = arith.constant 0 : i32
    %c0_i32_0 = arith.constant 0 : i32
    %c0_i32_1 = arith.constant 0 : i32
    %c0_i32_2 = arith.constant 0 : i32
    return %c0_i32, %c0_i32_0, %c0_i32_1 : i32, i32, i32
  }
  func.func @transform_1(%arg0: i32) -> (i32, i32) {
    %c0_i32 = arith.constant 0 : i32
    %c0_i32_0 = arith.constant 0 : i32
    %c0_i32_1 = arith.constant 0 : i32
    return %c0_i32, %c0_i32_0 : i32, i32
  }
  func.func @transform_2(%arg0: i32) -> (i32, i32) {
    %c0_i32 = arith.constant 0 : i32
    %c0_i32_0 = arith.constant 0 : i32
    %c0_i32_1 = arith.constant 0 : i32
    return %c0_i32, %c0_i32_0 : i32, i32
  }
  func.func @transform_3(%arg0: i32) -> (i32, i32) {
    %c0_i32 = arith.constant 0 : i32
    %c0_i32_0 = arith.constant 0 : i32
    %c0_i32_1 = arith.constant 0 : i32
    return %c0_i32, %c0_i32_0 : i32, i32
  }
  func.func @transform_4(%arg0: i32) -> (i32, i32) {
    %c0_i32 = arith.constant 0 : i32
    %c0_i32_0 = arith.constant 0 : i32
    %c0_i32_1 = arith.constant 0 : i32
    return %c0_i32, %c0_i32_0 : i32, i32
  }
  func.func @transform_5(%arg0: i32) -> (i32, i32) {
    %c0_i32 = arith.constant 0 : i32
    %c0_i32_0 = arith.constant 0 : i32
    %c0_i32_1 = arith.constant 0 : i32
    return %c0_i32, %c0_i32_0 : i32, i32
  }
}

</mosaic_0001>

<bundles_post_ra>
// kernel: saluki_forward.3
= control target key start
LH: loop header
LB: loop body
LE: loop exit
PB: predicated region body
PF: predicated region fallthrough
CT: control target
= control target key end

     0   :  { %10 = vsyncpa [#allocation3], 0  ;;  %v348_v5 = vmov 0.0   ;;  %s412_s28 = smov 0   ;;  %s441_s0 = inlined_call_operand.vmem [shape: f32[12,2,96], index: 0, kind: input, shape index: {}]   ;;  %s442_s1 = inlined_call_operand.vmem [shape: bf16[32,96], index: 1, kind: input, shape index: {}]   ;;  %s443_s2 = inlined_call_operand.vmem [shape: f32[1,32], index: 2, kind: input, shape index: {}]   ;;  %s444_s3 = inlined_call_operand.vmem [shape: bf16[32,32], index: 3, kind: input, shape index: {}]   ;;  %s445_s4 = inlined_call_operand.vmem [shape: f32[4,32], index: 4, kind: input, shape index: {}]   ;;  %s446_s5 = inlined_call_operand.hbm [shape: f32[2,32], index: 5, kind: output, shape index: {}]  }
   0x1   :  { %v398_v0 = vld [vmem:[%s442_s1] sm:$0xf]  ;;  %v23_v1 = vld [vmem:[%s442_s1 + $0x4] sm:$0xf]  ;;  %v24_v2 = vld [vmem:[%s442_s1 + $0x8] sm:$0xf] }
   0x2   :  { %v25_v3 = vld [vmem:[%s442_s1 + $0xc] sm:$0xf]  ;;  %v259_v4 = vld [vmem:[%s443_s2] ss:$0 sm:$0xff] }
   0x3 LB: > { %v256_v6 = vcombine.low %v24_v2, %v25_v3  ;;  %v356_v7 = vmov 0.0   ;;  %v38_v8 = vpack.c.bf16 %v350_v5, %v350_v5  ;;  %v255_v9 = vcombine.low %v398_v0, %v23_v1  ;;  %s358_s1 = smov 96   ;;  %s359_s2 = smov 64   ;;  %s354_s28 = sphi %s412_s28, %s32_s28   ;;  %v350_v5 = vphi %v348_v5, %v349_v5  }
   0x4   : > { %269 = vmatprep.subr.bf16.mxu0 %v356_v7  ;;  %vm357_vm0 = vmmov 0   ;;  %vm54_vm1 = vcmask 261120   ;;  %s34_s29 = ssub.s32 11, %s354_s28  ;;  %s32_s28 = sadd.s32 1, %s354_s28  }
   0x5   : > { %270 = vmatpush3.bf16.msra.mxu0 %v256_v6  ;;  %273 = vmatprep.mubr.msk.bf16.mxu0 %vm357_vm0, %v356_v7  ;;  %s254_s30 = sshll.u32 %s34_s29, 1  ;;  %p29_p0 = scmp.ge.s32.totalorder %s32_s28, 12  }
   0x6   : > { %271 = vmatprep.subr.bf16.mxu0 %v356_v7  ;;  %40 = vrot.lane.b32.xlu0 %v38_v8, %s358_s1  ;;  %s36_s8 = scalar_lea.vmem %s441_s0, %s254_s30  ;;  %v134_v33 = vlaneseq (%p29_p0)  ;;  %v133_v35 = vld [vmem:[%s445_s4] sm:$0xf] (%p29_p0)  ;;  %v316_v38 = vld [vmem:[%s444_s3 + $0x8] sm:$0xff] (%p29_p0)   ;;  %v360_v40 = vmov (%p29_p0), 0.0   ;;  %vm361_vm2 = vmmov (%p29_p0), 0   ;;  %s362_s0 = smov (%p29_p0), 32  }
   0x7   : > { %v37_v17 = vld [vmem:[%s36_s8] sm:$0x3]  ;;  %s363_s4 = smov (%p29_p0), 96   ;;  %vm228_vm3 = vcmask (%p29_p0), 254976  }
   0x8   :  { %v135_v34 = vshrl.u32 (%p29_p0), %v134_v33, 7  ;;  %v317_v41 = vld [vmem:[%s444_s3] sm:$0xff] (%p29_p0)   ;;  %s364_s3 = smov (%p29_p0), [#allocation2]  }
   0x9   : > { %272 = vmatpush3.bf16.msra.mxu0 %v255_v9  ;;  %s236_s15 = sshll.u32 (%p29_p0), %s364_s3, 4  ;;  %s237_s15 = int_to_ptr.vmem [resolvable:$true] %s236_s15 }
   0xa   : > { %110 = vrot.lane.b32.xlu0 %v259_v4, %s359_s2  ;;  %v136_v36 = vsub.s32 (%p29_p0), 0, %v135_v34  ;;  %v145_v37 = vsub.s32 (%p29_p0), 1, %v135_v34  ;;  %277 = vmatprep.subr.bf16.mxu0 (%p29_p0), %v360_v40  ;;  %v219_v50 = vsub.s32 (%p29_p0), 2, %v135_v34  ;;  %v224_v51 = vsub.s32 (%p29_p0), 3, %v135_v34  ;;  %s318_s16 = scalar_lea.vmem (%p29_p0), %s237_s15, 32  ;;  %p323_p2 = scmp.lt.s32.totalorder (%p29_p0), %s237_s15, %s237_s15 }
   0xb   :  { %p319_p1 = scmp.ne.s32.totalorder (%p29_p0), %s237_s15, %s318_s16  ;;  %p324_p3 = scmp.lt.s32.totalorder (%p29_p0), %s318_s16, %s318_s16 }
   0xc   :  { %v137_v39 = vrot.slane (%p29_p0), %v133_v35, %v136_v36  ;;  %v146_v42 = vrot.slane (%p29_p0), %v133_v35, %v145_v37  ;;  %v220_v52 = vrot.slane (%p29_p0), %v133_v35, %v219_v50  ;;  %v225_v53 = vrot.slane (%p29_p0), %v133_v35, %v224_v51 }
   0xd   :  { %p325_p4 = por (%p29_p0), %p324_p3, %p323_p2 }
   0xf   :  { %p326_p5 = pnand (%p29_p0), %p325_p4, %p319_p1 }
  0x78   : > { %v41_v10 = vpop.permute.xlu0 %40 }
  0x79   : > { %274 = vmatmul.mubr.msk.bf16.vlgmr.msra.gmra.mxu0 %vm54_vm1, %v41_v10 }
  0x7a   :  { %281 = vmatprep.mubr.msk.bf16.mxu0 (%p29_p0), %vm361_vm2, %v360_v40  ;;  %278 = vmatpush3.bf16.msra.mxu0 (%p29_p0), %v316_v38 }
  0x7b   :  { %279 = vmatprep.subr.bf16.mxu0 (%p29_p0), %v360_v40 }
  0x7c   : > { %v111_v11 = vpop.permute.xlu0 %110 }
  0x7e   :  { %280 = vmatpush3.bf16.msra.mxu0 (%p29_p0), %v317_v41 }
 0x139   : > { %v92_v12 = vpop.f32.mrf.mxu0 }
 0x13a   : > { %v113_v13 = vadd.f32 %v111_v11, %v92_v12  ;;  %v98_v18 = vadd.f32 %v92_v12, %v37_v17 }
 0x13b   : > { %v275_v14 = vpop.f32.mrf.mxu0 }
 0x13c   : > { %115 = vrot.lane.b32.xlu1 %v113_v13, %s359_s2  ;;  %v258_v19 = vmul.f32 -1.442695, %v98_v18 }
 0x13d   : > { %v95_v15 = vpop.f32.mrf.mxu0 }
 0x13e   : > { %310 = vpow2.f32 %v258_v19 }
 0x13f   : > { %v276_v16 = vpop.f32.mrf.mxu0 }
 0x14b   : > { %v311_v20 = vpop.eup %310 }
 0x14c   : > { %v102_v21 = vadd.f32 1.0, %v311_v20 }
 0x14e   : > { %312 = vrcp.f32 %v102_v21 }
 0x15b   : > { %v313_v22 = vpop.eup %312 }
 0x15c   : > { %v125_v28 = vsub.f32 1.0, %v313_v22  ;;  %v131_v30 = vmul.f32 %v350_v5, %v313_v22 }
 0x1ae   : > { %v116_v23 = vpop.permute.xlu1 %115 }
 0x1af   : > { %v118_v24 = vmul.f32 %v313_v22, %v116_v23 }
 0x1b1   : > { %120 = vrot.lane.b32.xlu1 %v118_v24, %s359_s2 }
 0x223   : > { %v121_v25 = vpop.permute.xlu1 %120 }
 0x224   : > { %v123_v26 = vadd.f32 %v121_v25, %v37_v17 }
 0x226   : > { %314 = vtanh.f32 %v123_v26 }
 0x233   : > { %v315_v27 = vpop.eup %314 }
 0x234   : > { %127 = vrot.lane.b32.xlu0 %v315_v27, %s358_s1 }
 0x238   :  { %139 = vrot.lane.b32.xlu0 (%p29_p0), %v137_v39, %s362_s0 }
 0x23c   :  { %148 = vrot.lane.b32.xlu0 (%p29_p0), %v146_v42, %s362_s0 }
 0x2a6   : > { %v128_v29 = vpop.permute.xlu0 %127 }
 0x2a7   : > { %v130_v31 = vmul.f32 %v128_v29, %v125_v28  ;;  %31 = sbr.rel (!%p29_p0) target bundleno = 3 (0x3), region = 48 }
 0x2a9   : > { %v132_v32 = vadd.f32 %v131_v30, %v130_v31  }
 0x2aa   :  { %v140_v43 = vpop.permute.xlu0 (%p29_p0), %139 }
 0x2ab   : > { %v349_v5 = vmov %v132_v32   ;;  %v142_v44 = vmul.f32 (%p29_p0), %v140_v43, %v132_v32 }
 0x2ae   :  { %v149_v45 = vpop.permute.xlu0 %148 }
 0x2af   :  { %v151_v46 = vadd.f32 %v149_v45, %v142_v44 }
 0x2b1   :  { %v152_v47 = vmax.f32 %v151_v46, 0.0 }
 0x2b3   :  { %v153_v48 = vpack.c.bf16 %v152_v47, %v152_v47 }
 0x2b5   :  { %159 = vrot.lane.b32.xlu1 %v153_v48, %s363_s4 }
 0x327   :  { %v160_v49 = vpop.permute.xlu1 %159 }
 0x328   :  { %282 = vmatmul.mubr.msk.bf16.vlgmr.msra.gmra.mxu0 %vm54_vm1, %v160_v49 }
 0x3e8   :  { %v211_v54 = vpop.f32.mrf.mxu0 }
 0x3e9   :  { %v221_v55 = vmul.f32 %v220_v52, %v211_v54 }
 0x3ea   :  { %v283_v56 = vpop.f32.mrf.mxu0 }
 0x3eb   :  { %v226_v57 = vadd.f32 %v225_v53, %v221_v55 }
 0x3ec   :  { %v214_v58 = vpop.f32.mrf.mxu0 }
 0x3ed   :  { %v227_v59 = vmax.f32 %v226_v57, 0.0 }
 0x3ee   :  { %v284_v60 = vpop.f32.mrf.mxu0 }
 0x3ef   :  { %229 = vst.msk [vmem:[#allocation2] sm:$0x3] %vm228_vm3, %v227_v59 }
 0x3f0   :  { %329 = shalt.err (!%p326_p5)
}
 0x3f1   :  { %239 = dma.vmem_to_hbm [thread:$0]  %s237_s15, 32, %s446_s5, [#allocation3]  }
 0x3f2   :  { %346 = dma.done.wait [#allocation3], 32  }
 0x3f3   :  { %347 = vsyncadd [#allocation3], 4294967264 }
 0x3f4   :  { %243 = vsyncpa [#allocation3], 1 }

// kernel: saluki_forward.2
= control target key start
LH: loop header
LB: loop body
LE: loop exit
PB: predicated region body
PF: predicated region fallthrough
CT: control target
= control target key end

     0   :  { %s2574_s21 = smov 0   ;;  %s2943_s0 = inlined_call_operand.vmem [shape: f32[2,64,6], index: 0, kind: input, shape index: {}]   ;;  %s2944_s1 = inlined_call_operand.vmem [shape: bf16[5,6,32], index: 1, kind: input, shape index: {}]   ;;  %s2945_s2 = inlined_call_operand.vmem [shape: bf16[2,5,32,32], index: 2, kind: input, shape index: {}]   ;;  %s2946_s3 = inlined_call_operand.vmem [shape: f32[2,1,32], index: 3, kind: input, shape index: {}]   ;;  %s2947_s4 = inlined_call_operand.vmem [shape: bf16[32,96], index: 4, kind: input, shape index: {}]   ;;  %s2948_s5 = inlined_call_operand.vmem [shape: f32[1,96], index: 5, kind: input, shape index: {}]   ;;  %s2949_s6 = inlined_call_operand.vmem [shape: f32[2,12,96], index: 6, kind: output, shape index: {}]  }
   0x1 LB: > { %s2102_s22 = sadd.s32 4294967295, %s2535_s21   ;;  %p2106_p0 = scmp.ge.s32.totalorder %s2535_s21, 1  ;;  %s2535_s21 = sphi %s2574_s21, %s16_s21  }
   0x2   : > { %p212_p1 = scmp.lt.s32.totalorder %s2535_s21, 3 }
   0x4   : > { %p213_p2 = pnand %p2106_p0, %p212_p1 }
   0x5   : > { %p242_p3 = scmp.lt.s32.totalorder (!%p213_p2), %s2102_s22, 1 }
   0x6   : > { %216 = sbr.rel (%p213_p2) target bundleno = 1826 (0x722), region = 44 }
   0xb   : > { %v2111_v0 = vld [vmem:[%s2944_s1 + $0x4] sm:$0x7]  ;;  %vm313_vm0 = vcmask 1042432   ;;  %v265_v1 = vld [vmem:[%s2944_s1] sm:$0x7]  ;;  %s2951_s22 = smov (!%p242_p3, %s2102_s22), 1 }
   0xc   : > { %2468 = vmatprep.subr.msk.bf16.mxu0 %vm313_vm0, %v2111_v0  ;;  %v315_v2 = vsel %vm313_vm0, %v2111_v0, 0  ;;  %2469 = vmatprep.subr.msk.bf16.mxu1 %vm313_vm0, %v265_v1  ;;  %v391_v3 = vsel %vm313_vm0, %v265_v1, 0  ;;  %v2120_v4 = vld [vmem:[%s2944_s1 + $0x8] sm:$0x7]  ;;  %v2125_v5 = vld [vmem:[%s2944_s1 + $0xc] sm:$0x7] }
   0xd   : > { %2311 = vmatpush3.bf16.msra.mxu0 %v315_v2  ;;  %2321 = vmatpush3.bf16.msra.mxu1 %v391_v3  ;;  %s2230_s7 = sshll.u32 %s2951_s22, 6  ;;  %vm300_vm1 = vcmask 48128   ;;  %v591_v17 = vsel %vm313_vm0, %v2125_v5, 0  ;;  %vm268_vm2 = vsmask.f32 7424  ;;  %v485_v30 = vsel %vm313_vm0, %v2120_v4, 0 }
   0xe   : > { %2470 = vmatprep.subr.msk.bf16.mxu0 %vm313_vm0, %v2120_v4  ;;  %2471 = vmatprep.subr.msk.bf16.mxu1 %vm313_vm0, %v2125_v5  ;;  %s246_s10 = scalar_lea.vmem %s2943_s0, %s2230_s7  ;;  %vm562_vm3 = vsmask.f32 6400  ;;  %v2130_v38 = vld [vmem:[%s2944_s1 + $0x10] sm:$0x7]  ;;  %vm464_vm4 = vcmask 1046528   ;;  %vm668_vm5 = vcmask 1045504  }
   0xf   : > { %v253_v6 = vld [vmem:[%s246_s10] sm:$0xff]  ;;  %v254_v7 = vld [vmem:[%s246_s10 + $0x8] sm:$0xff]  ;;  %v255_v8 = vld [vmem:[%s246_s10 + $0x10] sm:$0xff]  ;;  %v689_v61 = vsel %vm313_vm0, %v2130_v38, 0  ;;  %vm764_vm6 = vcmask 261120   ;;  %vm778_vm7 = vcmask 257024  }
  0x10   : > { %v256_v9 = vld [vmem:[%s246_s10 + $0x18] sm:$0xff]  ;;  %v2606_v10 = vpack.c.bf16 %v254_v7, %v253_v6  ;;  %v257_v11 = vld [vmem:[%s246_s10 + $0x20] sm:$0xff]  ;;  %v258_v12 = vld [vmem:[%s246_s10 + $0x28] sm:$0xff]  ;;  %vm2538_vm8 = vmmov 0   ;;  %s2231_s19 = sshll.u32 %s2951_s22, 4  ;;  %vm2043_vm9 = vcmask 785408  }
  0x11   : > { %v2608_v13 = vpack.c.bf16 %v256_v9, %v255_v8  ;;  %v2610_v14 = vpack.c.bf16 %v258_v12, %v257_v11  ;;  %v259_v15 = vld [vmem:[%s246_s10 + $0x30] sm:$0xff]  ;;  %v260_v16 = vld [vmem:[%s246_s10 + $0x38] sm:$0xff]  ;;  %s251_s26 = scalar_lea.vmem %s2949_s6, %s2231_s19  ;;  %vm2045_vm10 = vcmask 781312  }
  0x12   : > { %v270_v18 = vshrl.u32 %v2606_v10, 16  ;;  %v272_v19 = vshll.u32 %v2606_v10, 16  ;;  %2322 = vmatprep.mubr.msk.bf16.mxu1 %vm300_vm1, %v2606_v10  ;;  %v2617_v20 = vpack.c.bf16 %v260_v16, %v259_v15  ;;  %v465_v48 = vrot.slane %v2606_v10, 1 }
  0x13   : > { %v277_v21 = vshll.u32 %v2608_v13, 16  ;;  %v281_v22 = vshrl.u32 %v2608_v13, 16  ;;  %v285_v23 = vshll.u32 %v2610_v14, 16  ;;  %2323 = vmatmul.mubr.msk.bf16.vlgmr.msra.gmra.mxu1 %vm300_vm1, %v2608_v13  ;;  %v289_v24 = vshrl.u32 %v2610_v14, 16 }
  0x14   : > { %v274_v25 = vrot.slane %v272_v19, 1  ;;  %v293_v26 = vshll.u32 %v2617_v20, 16  ;;  %2326 = vmatprep.mubr.msk.bf16.mxu1 %vm300_vm1, %v2610_v14  ;;  %2341 = vmatpush3.bf16.msra.mxu1 %v591_v17  ;;  %v563_v28 = vrot.slane %v270_v18, 1  ;;  %v297_v34 = vshrl.u32 %v2617_v20, 16 }
  0x15   : > { %v279_v27 = vrot.slane %v277_v21, 1  ;;  %v287_v29 = vrot.slane %v285_v23, 1  ;;  %v567_v32 = vrot.slane %v277_v21, 2  ;;  %v571_v36 = vrot.slane %v285_v23, 2 }
  0x16   : > { %v275_v31 = vor.u32 %v274_v25, %v270_v18  ;;  %v295_v33 = vrot.slane %v293_v26, 1  ;;  %v564_v39 = vrot.slane %v272_v19, 2  ;;  %v570_v41 = vrot.slane %v289_v24, 1 }
  0x17   : > { %v283_v35 = vor.u32 %v281_v22, %v279_v27  ;;  %v291_v37 = vor.u32 %v289_v24, %v287_v29  ;;  %v566_v42 = vrot.slane %v281_v22, 1  ;;  %v574_v47 = vrot.slane %v297_v34, 1 }
  0x18   : > { %v280_v40 = vsel %vm268_vm2, %v275_v31, %v279_v27  ;;  %v565_v45 = vor.u32 %v564_v39, %v563_v28  ;;  %v575_v49 = vrot.slane %v293_v26, 2  ;;  %v466_v50 = vrot.slane %v2608_v13, 1 }
  0x19   : > { %2312 = vmatprep.mubr.msk.bf16.mxu0 %vm300_vm1, %v280_v40  ;;  %v288_v43 = vsel %vm268_vm2, %v283_v35, %v287_v29  ;;  %v296_v44 = vsel %vm268_vm2, %v291_v37, %v295_v33  ;;  %v568_v46 = vor.u32 %v567_v32, %v566_v42  ;;  %v468_v51 = vrot.slane %v2610_v14, 1 }
  0x1a   : > { %2313 = vmatmul.mubr.msk.bf16.vlgmr.msra.gmra.mxu0 %vm300_vm1, %v288_v43  ;;  %v572_v53 = vor.u32 %v571_v36, %v570_v41  ;;  %v299_v54 = vor.u32 %v297_v34, %v295_v33  ;;  %v576_v55 = vor.u32 %v575_v49, %v574_v47  ;;  %v467_v56 = vsel %vm464_vm4, %v465_v48, %v466_v50 }
  0x1b   : > { %2331 = vmatpush3.bf16.msra.mxu0 %v485_v30  ;;  %2316 = vmatprep.mubr.msk.bf16.mxu0 %vm300_vm1, %v296_v44  ;;  %v569_v52 = vsel %vm562_vm3, %v565_v45, %v568_v46  ;;  %v470_v59 = vrot.slane %v2617_v20, 1  ;;  %v469_v60 = vsel %vm464_vm4, %v466_v50, %v468_v51  ;;  %v669_v63 = vrot.slane %v2606_v10, 2 }
  0x1c   : > { %2327 = vmatmul.mubr.msk.bf16.gmra.mxu1 %vm300_vm1, %v2617_v20  ;;  %2472 = vmatprep.subr.msk.bf16.mxu0 %vm313_vm0, %v2130_v38  ;;  %v573_v57 = vsel %vm562_vm3, %v568_v46, %v572_v53  ;;  %v577_v58 = vsel %vm562_vm3, %v572_v53, %v576_v55  ;;  %v670_v0 = vrot.slane %v2608_v13, 2  ;;  %v672_v2 = vrot.slane %v2610_v14, 2 }
  0x1d   : > { %2342 = vmatprep.mubr.msk.bf16.mxu1 %vm300_vm1, %v569_v52  ;;  %v471_v62 = vsel %vm464_vm4, %v468_v51, %v470_v59  ;;  %v674_v3 = vrot.slane %v2617_v20, 2 }
  0x1e   : > { %v671_v1 = vsel %vm668_vm5, %v669_v63, %v670_v0  ;;  %v673_v4 = vsel %vm668_vm5, %v670_v0, %v672_v2 }
  0x1f   : > { %v675_v5 = vsel %vm668_vm5, %v672_v2, %v674_v3 }
  0x22   : > { %2317 = vmatmul.mubr.msk.bf16.gmra.mxu0 %vm300_vm1, %v299_v54 }
  0x23   : > { %2332 = vmatprep.mubr.msk.bf16.mxu0 %vm300_vm1, %v467_v56 }
  0x24   : > { %2343 = vmatmul.mubr.msk.bf16.vlgmr.msra.gmra.mxu1 %vm300_vm1, %v573_v57 }
  0x25   : > { %2346 = vmatprep.mubr.msk.bf16.mxu1 %vm300_vm1, %v577_v58 }
  0x2a   : > { %2333 = vmatmul.mubr.msk.bf16.vlgmr.msra.gmra.mxu0 %vm300_vm1, %v469_v60 }
  0x2b   : > { %2351 = vmatpush3.bf16.msra.mxu0 %v689_v61  ;;  %2336 = vmatprep.mubr.msk.bf16.mxu0 %vm300_vm1, %v471_v62 }
  0x2c   : > { %2347 = vmatmul.mubr.msk.bf16.gmra.mxu1 %vm300_vm1, %v576_v55 }
  0x32   : > { %2337 = vmatmul.mubr.msk.bf16.gmra.mxu0 %vm300_vm1, %v470_v59 }
  0x33   : > { %2352 = vmatprep.mubr.msk.bf16.mxu0 %vm300_vm1, %v671_v1 }
  0x3a   : > { %2353 = vmatmul.mubr.msk.bf16.vlgmr.msra.gmra.mxu0 %vm300_vm1, %v673_v4 }
  0x3b   : > { %2356 = vmatprep.mubr.msk.bf16.mxu0 %vm300_vm1, %v675_v5 }
  0x42   : > { %2357 = vmatmul.mubr.msk.bf16.gmra.mxu0 %vm300_vm1, %v674_v3 }
  0xd3   : > { %v2324_v6 = vpop.f32.mrf.mxu1 }
  0xd5   : > { %v427_v7 = vpop.f32.mrf.mxu1 }
  0xd7   : > { %v2325_v8 = vpop.f32.mrf.mxu1 }
  0xd9   : > { %v430_v9 = vpop.f32.mrf.mxu1 }
  0xda   : > { %v2314_v10 = vpop.f32.mrf.mxu0 }
  0xdb   : > { %v436_v34 = vadd.f32 %v2324_v6, %v2314_v10 }
  0xdc   : > { %v351_v11 = vpop.f32.mrf.mxu0  ;;  %v2328_v12 = vpop.f32.mrf.mxu1 }
  0xdd   : > { %v428_v32 = vadd.f32 %v427_v7, %v351_v11 }
  0xde   : > { %v2315_v13 = vpop.f32.mrf.mxu0  ;;  %v443_v14 = vpop.f32.mrf.mxu1 }
  0xdf   : > { %v439_v38 = vadd.f32 %v2325_v8, %v2315_v13 }
  0xe0   : > { %v354_v15 = vpop.f32.mrf.mxu0  ;;  %v2329_v17 = vpop.f32.mrf.mxu1 }
  0xe1   : > { %v431_v39 = vadd.f32 %v430_v9, %v354_v15 }
  0xe2   : > { %v2318_v16 = vpop.f32.mrf.mxu0  ;;  %v446_v20 = vpop.f32.mrf.mxu1 }
  0xe3   : > { %v452_v50 = vadd.f32 %v2328_v12, %v2318_v16 }
  0xe4   : > { %v367_v18 = vpop.f32.mrf.mxu0  ;;  %v2344_v22 = vpop.f32.mrf.mxu1 }
  0xe5   : > { %v444_v45 = vadd.f32 %v443_v14, %v367_v18 }
  0xe6   : > { %v2319_v19 = vpop.f32.mrf.mxu0  ;;  %v627_v25 = vpop.f32.mrf.mxu1 }
  0xe7   : > { %v455_v63 = vadd.f32 %v2329_v17, %v2319_v19 }
  0xe8   : > { %v370_v21 = vpop.f32.mrf.mxu0  ;;  %v2345_v28 = vpop.f32.mrf.mxu1 }
  0xe9   : > { %v447_v56 = vadd.f32 %v446_v20, %v370_v21 }
  0xea   : > { %v2334_v23 = vpop.f32.mrf.mxu0  ;;  %v630_v30 = vpop.f32.mrf.mxu1 }
  0xeb   : > { %v554_v40 = vadd.f32 %v2334_v23, %v436_v34 }
  0xec   : > { %v521_v24 = vpop.f32.mrf.mxu0  ;;  %v2348_v36 = vpop.f32.mrf.mxu1 }
  0xed   : > { %v552_v35 = vadd.f32 %v521_v24, %v428_v32  ;;  %v660_v48 = vadd.f32 %v2344_v22, %v554_v40 }
  0xee   : > { %v2335_v26 = vpop.f32.mrf.mxu0  ;;  %v643_v46 = vpop.f32.mrf.mxu1 }
  0xef   : > { %v555_v42 = vadd.f32 %v2335_v26, %v439_v38  ;;  %v658_v43 = vadd.f32 %v627_v25, %v552_v35 }
  0xf0   : > { %v524_v27 = vpop.f32.mrf.mxu0  ;;  %v2349_v58 = vpop.f32.mrf.mxu1 }
  0xf1   : > { %v553_v44 = vadd.f32 %v524_v27, %v431_v39  ;;  %v661_v53 = vadd.f32 %v2345_v28, %v555_v42 }
  0xf2   : > { %v2338_v29 = vpop.f32.mrf.mxu0  ;;  %v646_v9 = vpop.f32.mrf.mxu1 }
  0xf3   : > { %v659_v54 = vadd.f32 %v630_v30, %v553_v44  ;;  %v558_v57 = vadd.f32 %v2338_v29, %v452_v50 }
  0xf4   : > { %v537_v31 = vpop.f32.mrf.mxu0 }
  0xf5   : > { %v556_v51 = vadd.f32 %v537_v31, %v444_v45  ;;  %v664_v7 = vadd.f32 %v2348_v36, %v558_v57 }
  0xf6   : > { %v2339_v33 = vpop.f32.mrf.mxu0 }
  0xf7   : > { %v662_v0 = vadd.f32 %v643_v46, %v556_v51  ;;  %v559_v8 = vadd.f32 %v2339_v33, %v455_v63 }
  0xf8   : > { %v540_v37 = vpop.f32.mrf.mxu0 }
  0xf9   : > { %v557_v1 = vadd.f32 %v540_v37, %v447_v56  ;;  %v665_v28 = vadd.f32 %v2349_v58, %v559_v8  ;;  %v2504_v8 = vld [vmem:[%s2945_s2 + $0x10] sm:$0xff]  }
  0xfa   : > { %v2354_v41 = vpop.f32.mrf.mxu0 }
  0xfb   : > { %v2675_v55 = vadd.f32 %v2354_v41, %v660_v48  ;;  %v663_v21 = vadd.f32 %v646_v9, %v557_v1  ;;  %v2502_v1 = vld [vmem:[%s2945_s2 + $0x8] sm:$0xff]  }
  0xfc   : > { %v725_v47 = vpop.f32.mrf.mxu0  ;;  %2372 = vmatprep.subr.bf16.mxu0 %v2502_v1 }
  0xfd   : > { %v2673_v49 = vadd.f32 %v725_v47, %v658_v43  ;;  %v792_v3 = vmul.f32 %v2675_v55, %v2675_v55  ;;  %v768_v10 = vsel %vm764_vm6, %v2675_v55, 0.0  ;;  %2373 = vmatpush3.bf16.msra.mxu0 %v2502_v1 }
  0xfe   : > { %v2355_v52 = vpop.f32.mrf.mxu0 }
  0xff   : > { %v790_v60 = vmul.f32 %v2673_v49, %v2673_v49  ;;  %v2679_v61 = vadd.f32 %v2355_v52, %v661_v53  ;;  %v765_v4 = vsel %vm764_vm6, %v2673_v49, 0.0  ;;  %v801_v22 = vsel %vm764_vm6, %v792_v3, 0.0  ;;  %v2501_v53 = vld [vmem:[%s2945_s2 + $0x18] sm:$0xff]  }
 0x100   : > { %v728_v59 = vpop.f32.mrf.mxu0  ;;  %2360 = vmatprep.subr.bf16.mxu1 %v2501_v53 }
 0x101   : > { %v2681_v62 = vadd.f32 %v728_v59, %v659_v54  ;;  %v798_v13 = vsel %vm764_vm6, %v790_v60, 0.0  ;;  %v793_v14 = vmul.f32 %v2679_v61, %v2679_v61  ;;  %v770_v23 = vsel %vm764_vm6, %v2679_v61, 0.0  ;;  %2361 = vmatpush3.bf16.msra.mxu1 %v2501_v53 }
 0x102   : > { %v2358_v2 = vpop.f32.mrf.mxu0  ;;  %2362 = vmatprep.subr.bf16.mxu1 %v2504_v8 }
 0x103   : > { %v766_v5 = vsel %vm764_vm6, %v2681_v62, 0.0  ;;  %v791_v6 = vmul.f32 %v2681_v62, %v2681_v62  ;;  %v2699_v19 = vadd.f32 %v2358_v2, %v664_v7  ;;  %v803_v29 = vsel %vm764_vm6, %v793_v14, 0.0 }
 0x104   : > { %v767_v11 = vadd.f32 %v766_v5, %v765_v4  ;;  %v741_v12 = vpop.f32.mrf.mxu0 }
 0x105   : > { %v799_v15 = vsel %vm764_vm6, %v791_v6, 0.0  ;;  %v2697_v16 = vadd.f32 %v741_v12, %v662_v0  ;;  %v796_v32 = vmul.f32 %v2699_v19, %v2699_v19  ;;  %v776_v41 = vsel %vm764_vm6, %v2699_v19, 0.0  ;;  %v2503_v6 = vld [vmem:[%s2945_s2] sm:$0xff]   ;;  %2363 = vmatpush3.bf16.msra.mxu1 %v2504_v8 }
 0x106   : > { %v769_v17 = vadd.f32 %v768_v10, %v767_v11  ;;  %v800_v18 = vadd.f32 %v799_v15, %v798_v13  ;;  %v2359_v20 = vpop.f32.mrf.mxu0  ;;  %2374 = vmatprep.subr.bf16.mxu0 %v2503_v6  ;;  %v2744_v10 = vld [vmem:[%s2945_s2 + $0x28] sm:$0xff]   ;;  %v2506_v11 = vld [vmem:[%s2945_s2 + $0x38] sm:$0xff]  }
 0x107   : > { %v794_v24 = vmul.f32 %v2697_v16, %v2697_v16  ;;  %v772_v30 = vsel %vm764_vm6, %v2697_v16, 0.0  ;;  %v2714_v36 = vadd.f32 %v2359_v20, %v665_v28  ;;  %v809_v47 = vsel %vm764_vm6, %v796_v32, 0.0  ;;  %2375 = vmatpush3.bf16.msra.mxu0 %v2503_v6  ;;  %2384 = vmatprep.subr.bf16.mxu1 %v2744_v10 }
 0x108   : > { %v802_v25 = vadd.f32 %v801_v22, %v800_v18  ;;  %v744_v26 = vpop.f32.mrf.mxu0  ;;  %v771_v27 = vadd.f32 %v770_v23, %v769_v17  ;;  %2396 = vmatprep.subr.bf16.mxu0 %v2506_v11 }
 0x109   : > { %v2709_v31 = vadd.f32 %v744_v26, %v663_v21  ;;  %v805_v35 = vsel %vm764_vm6, %v794_v24, 0.0  ;;  %v779_v45 = vsel %vm778_vm7, %v2714_v36, 0.0  ;;  %v797_v46 = vmul.f32 %v2714_v36, %v2714_v36 }
 0x10a   : > { %v773_v33 = vadd.f32 %v772_v30, %v771_v27  ;;  %v804_v34 = vadd.f32 %v803_v29, %v802_v25 }
 0x10b   : > { %v795_v37 = vmul.f32 %v2709_v31, %v2709_v31  ;;  %v774_v38 = vsel %vm764_vm6, %v2709_v31, 0.0  ;;  %v811_v51 = vsel %vm778_vm7, %v797_v46, 0.0 }
 0x10c   : > { %v775_v39 = vadd.f32 %v774_v38, %v773_v33  ;;  %v806_v40 = vadd.f32 %v805_v35, %v804_v34 }
 0x10d   : > { %v807_v42 = vsel %vm764_vm6, %v795_v37, 0.0 }
 0x10e   : > { %v777_v43 = vadd.f32 %v776_v41, %v775_v39  ;;  %v808_v44 = vadd.f32 %v807_v42, %v806_v40  ;;  %v2507_v42 = vld [vmem:[%s2945_s2 + $0x30] sm:$0xff]  }
 0x110   : > { %v780_v48 = vadd.f32 %v779_v45, %v777_v43  ;;  %v810_v50 = vadd.f32 %v809_v47, %v808_v44 }
 0x112   : > { %781 = vadd.xlane.f32.xlu0 %v780_v48  ;;  %v812_v52 = vadd.f32 %v811_v51, %v810_v50 }
 0x116   : > { %813 = vadd.xlane.f32.xlu0 %v812_v52 }
 0x19b   : > { %v782_v54 = vpop.xlane.xlu0 %781 }
 0x19c   : > { %v783_v56 = vrot.slane %v782_v54, 4 }
 0x19e   : > { %v784_v57 = vadd.f32 %v783_v56, %v782_v54 }
 0x19f   : > { %v814_v58 = vpop.xlane.xlu0 %813 }
 0x1a0   : > { %v785_v59 = vrot.slane %v784_v57, 2  ;;  %v815_v60 = vrot.slane %v814_v58, 4 }
 0x1a2   : > { %v816_v63 = vadd.f32 %v815_v60, %v814_v58  ;;  %v786_v0 = vadd.f32 %v785_v59, %v784_v57 }
 0x1a4   : > { %v817_v2 = vrot.slane %v816_v63, 2  ;;  %v787_v3 = vrot.slane %v786_v0, 1 }
 0x1a6   : > { %v788_v4 = vadd.f32 %v787_v3, %v786_v0  ;;  %v818_v5 = vadd.f32 %v817_v2, %v816_v63 }
 0x1a8   : > { %2473 = vpush %v788_v4  ;;  %v819_v7 = vrot.slane %v818_v5, 1  ;;  %v2508_v4 = vld [vmem:[%s2945_s2 + $0x20] sm:$0xff]  }
 0x1aa   : > { %v820_v9 = vadd.f32 %v819_v7, %v818_v5 }
 0x1ac   : > { %2475 = vpush %v820_v9 }
 0x1d9   : > { %s2474_s27 = spop %2473 }
 0x1da   : > { %s824_s28 = smul.f32 0.00052083336, %s2474_s27 }
 0x1dc   : > { %s828_s29 = smul.f32 %s824_s28, %s824_s28  ;;  %v830_v14 = vstv %s824_s28 }
 0x1dd   : > { %s2476_s30 = spop %2475  ;;  %v833_v15 = vsub.f32 %v2675_v55, %v830_v14  ;;  %v834_v17 = vsub.f32 %v2679_v61, %v830_v14  ;;  %v837_v18 = vsub.f32 %v2699_v19, %v830_v14  ;;  %v838_v20 = vsub.f32 %v2714_v36, %v830_v14 }
 0x1de   : > { %s827_s7 = smul.f32 0.00052083336, %s2476_s30  ;;  %v831_v21 = vsub.f32 %v2673_v49, %v830_v14  ;;  %v832_v23 = vsub.f32 %v2681_v62, %v830_v14  ;;  %v835_v24 = vsub.f32 %v2697_v16, %v830_v14  ;;  %v836_v25 = vsub.f32 %v2709_v31, %v830_v14 }
 0x1e0   : > { %s829_s8 = ssub.f32 %s827_s7, %s828_s29 }
 0x1e2   : > { %s839_s9 = sadd.f32 0.007, %s829_s8 }
 0x1e4   : > { %v840_v12 = vstv %s839_s9 }
 0x1e5   : > { %2523 = vrsqrt.f32 %v840_v12 }
 0x1f2   : > { %v2524_v13 = vpop.eup %2523 }
 0x1f3   : > { %2477 = vpush %v2524_v13  ;;  %v2509_v13 = vld [vmem:[%s2945_s2 + $0x48] sm:$0xff]  }
 0x224   : > { %s2478_s10 = spop %2477 }
 0x225   : > { %v843_v22 = vstv %s2478_s10 }
 0x226   : > { %v846_v26 = vmul.f32 %v843_v22, %v833_v15  ;;  %v847_v27 = vmul.f32 %v843_v22, %v834_v17  ;;  %v850_v28 = vmul.f32 %v843_v22, %v837_v18  ;;  %v851_v55 = vmul.f32 %v843_v22, %v838_v20 }
 0x227   : > { %v844_v29 = vmul.f32 %v843_v22, %v831_v21  ;;  %v845_v61 = vmul.f32 %v843_v22, %v832_v23  ;;  %v848_v30 = vmul.f32 %v843_v22, %v835_v24  ;;  %v849_v19 = vmul.f32 %v843_v22, %v836_v25  ;;  %v2510_v25 = vld [vmem:[%s2945_s2 + $0x40] sm:$0xff]  }
 0x228   : > { %v854_v32 = vmax.f32 %v846_v26, 0.0  ;;  %v855_v33 = vmax.f32 %v847_v27, 0.0  ;;  %v858_v34 = vmax.f32 %v850_v28, 0.0  ;;  %v859_v35 = vmax.f32 %v851_v55, 0.0 }
 0x229   : > { %v852_v49 = vmax.f32 %v844_v29, 0.0  ;;  %v853_v36 = vmax.f32 %v845_v61, 0.0  ;;  %v856_v37 = vmax.f32 %v848_v30, 0.0  ;;  %v857_v62 = vmax.f32 %v849_v19, 0.0 }
 0x22a   : > { %v2758_v38 = vpack.c.bf16 %v855_v33, %v854_v32  ;;  %v2760_v16 = vpack.c.bf16 %v859_v35, %v858_v34  ;;  %v863_v6 = vpack.c.bf16 %v858_v34, %v858_v34 }
 0x22b   : > { %v2762_v31 = vpack.c.bf16 %v853_v36, %v852_v49  ;;  %v2764_v39 = vpack.c.bf16 %v857_v62, %v856_v37 }
 0x22c   : > { %v882_v40 = vshll.u32 %v2758_v38, 16  ;;  %v886_v41 = vshrl.u32 %v2758_v38, 16  ;;  %v898_v48 = vshll.u32 %v2760_v16, 16  ;;  %v902_v63 = vshrl.u32 %v2760_v16, 16 }
 0x22d   : > { %2376 = vmatprep.mubr.msk.bf16.mxu0 %vm764_vm6, %v2762_v31  ;;  %v875_v43 = vshrl.u32 %v2762_v31, 16  ;;  %v877_v44 = vshll.u32 %v2762_v31, 16  ;;  %v890_v45 = vshll.u32 %v2764_v39, 16  ;;  %v894_v47 = vshrl.u32 %v2764_v39, 16 }
 0x22e   : > { %2377 = vmatmul.mubr.msk.bf16.vlgmr.msra.gmra.mxu0 %vm764_vm6, %v2758_v38  ;;  %v884_v46 = vrot.slane %v882_v40, 1  ;;  %v1197_v50 = vrot.slane %v886_v41, 1  ;;  %v1198_v54 = vrot.slane %v882_v40, 2  ;;  %v900_v1 = vrot.slane %v898_v48, 1 }
 0x22f   : > { %2380 = vmatprep.mubr.msk.bf16.mxu0 %vm764_vm6, %v2764_v39  ;;  %v879_v51 = vrot.slane %v877_v44, 1  ;;  %v892_v52 = vrot.slane %v890_v45, 1  ;;  %2397 = vmatpush3.bf16.msra.mxu0 %v2506_v11  ;;  %v1194_v53 = vrot.slane %v875_v43, 1  ;;  %v1195_v57 = vrot.slane %v877_v44, 2 }
 0x230   : > { %v888_v56 = vor.u32 %v886_v41, %v884_v46  ;;  %2398 = vmatprep.subr.bf16.mxu0 %v2507_v42  ;;  %v1199_v3 = vor.u32 %v1198_v54, %v1197_v50  ;;  %v1201_v7 = vrot.slane %v894_v47, 1  ;;  %v1202_v8 = vrot.slane %v890_v45, 2 }
 0x231   : > { %v880_v58 = vor.u32 %v879_v51, %v875_v43  ;;  %v896_v59 = vor.u32 %v894_v47, %v892_v52  ;;  %v1196_v2 = vor.u32 %v1195_v57, %v1194_v53  ;;  %v1205_v11 = vrot.slane %v902_v63, 1 }
 0x232   : > { %v893_v60 = vsel %vm268_vm2, %v888_v56, %v892_v52  ;;  %v1206_v12 = vrot.slane %v898_v48, 2  ;;  %v1087_v14 = vrot.slane %v2762_v31, 1  ;;  %v1203_v15 = vor.u32 %v1202_v8, %v1201_v7 }
 0x233   : > { %v885_v0 = vsel %vm268_vm2, %v880_v58, %v884_v46  ;;  %2399 = vmatpush3.bf16.msra.mxu0 %v2507_v42  ;;  %v901_v5 = vsel %vm268_vm2, %v896_v59, %v900_v1  ;;  %v1200_v9 = vsel %vm562_vm3, %v1196_v2, %v1199_v3  ;;  %v904_v17 = vor.u32 %v902_v63, %v900_v1 }
 0x234   : > { %2364 = vmatprep.mubr.msk.bf16.mxu1 %vm764_vm6, %v885_v0  ;;  %v1207_v18 = vor.u32 %v1206_v12, %v1205_v11  ;;  %v1204_v21 = vsel %vm562_vm3, %v1199_v3, %v1203_v15  ;;  %v1090_v23 = vrot.slane %v2764_v39, 1  ;;  %v1092_v24 = vrot.slane %v2760_v16, 1 }
 0x235   : > { %2365 = vmatmul.mubr.msk.bf16.vlgmr.msra.gmra.mxu1 %vm764_vm6, %v893_v60  ;;  %v1309_v28 = vrot.slane %v2762_v31, 2  ;;  %v1310_v55 = vrot.slane %v2758_v38, 2  ;;  %v1312_v61 = vrot.slane %v2764_v39, 2  ;;  %v1314_v30 = vrot.slane %v2760_v16, 2 }
 0x236   : > { %2385 = vmatpush3.bf16.msra.mxu1 %v2744_v10  ;;  %2368 = vmatprep.mubr.msk.bf16.mxu1 %vm764_vm6, %v901_v5  ;;  %v1088_v10 = vrot.slane %v2758_v38, 1  ;;  %v1208_v22 = vsel %vm562_vm3, %v1203_v15, %v1207_v18  ;;  %v1093_v27 = vsel %vm464_vm4, %v1090_v23, %v1092_v24 }
 0x237   : > { %2381 = vmatmul.mubr.msk.bf16.gmra.mxu0 %vm764_vm6, %v863_v6  ;;  %2386 = vmatprep.subr.bf16.mxu1 %v2508_v4  ;;  %v1311_v29 = vsel %vm668_vm5, %v1309_v28, %v1310_v55  ;;  %v1313_v19 = vsel %vm668_vm5, %v1310_v55, %v1312_v61  ;;  %v1315_v32 = vsel %vm668_vm5, %v1312_v61, %v1314_v30 }
 0x238   : > { %2400 = vmatprep.mubr.msk.bf16.mxu0 %vm764_vm6, %v1200_v9  ;;  %v1089_v20 = vsel %vm464_vm4, %v1087_v14, %v1088_v10  ;;  %v1091_v26 = vsel %vm464_vm4, %v1088_v10, %v1090_v23  ;;  %v2181_v9 = vld [vmem:[%s2946_s3] ss:$0 sm:$0xff] }
 0x23a   : > { %2387 = vmatpush3.bf16.msra.mxu1 %v2508_v4 }
 0x23b   : > { %2408 = vmatprep.subr.bf16.mxu1 %v2509_v13 }
 0x23d   : > { %2369 = vmatmul.mubr.msk.bf16.gmra.mxu1 %vm764_vm6, %v904_v17 }
 0x23e   : > { %2388 = vmatprep.mubr.msk.bf16.mxu1 %vm764_vm6, %v1089_v20 }
 0x23f   : > { %2401 = vmatmul.mubr.msk.bf16.vlgmr.msra.gmra.mxu0 %vm764_vm6, %v1204_v21 }
 0x240   : > { %2404 = vmatprep.mubr.msk.bf16.mxu0 %vm764_vm6, %v1208_v22 }
 0x245   : > { %2389 = vmatmul.mubr.msk.bf16.vlgmr.msra.gmra.mxu1 %vm764_vm6, %v1091_v26 }
 0x246   : > { %2409 = vmatpush3.bf16.msra.mxu1 %v2509_v13  ;;  %2392 = vmatprep.mubr.msk.bf16.mxu1 %vm764_vm6, %v1093_v27 }
 0x247   : > { %2405 = vmatmul.mubr.msk.bf16.gmra.mxu0 %vm764_vm6, %v1207_v18  ;;  %2410 = vmatprep.subr.bf16.mxu1 %v2510_v25 }
 0x24a   : > { %2411 = vmatpush3.bf16.msra.mxu1 %v2510_v25 }
 0x24d   : > { %2393 = vmatmul.mubr.msk.bf16.gmra.mxu1 %vm764_vm6, %v1092_v24 }
 0x24e   : > { %2412 = vmatprep.mubr.msk.bf16.mxu1 %vm764_vm6, %v1311_v29 }
 0x255   : > { %2413 = vmatmul.mubr.msk.bf16.vlgmr.msra.gmra.mxu1 %vm764_vm6, %v1313_v19 }
 0x256   : > { %2416 = vmatprep.mubr.msk.bf16.mxu1 %vm764_vm6, %v1315_v32 }
 0x25d   : > { %2417 = vmatmul.mubr.msk.bf16.gmra.mxu1 %vm764_vm6, %v1314_v30 }
 0x2ee   : > { %v2378_v33 = vpop.f32.mrf.mxu0 }
 0x2f0   : > { %v1048_v34 = vpop.f32.mrf.mxu0 }
 0x2f2   : > { %v2379_v35 = vpop.f32.mrf.mxu0 }
 0x2f4   : > { %v1051_v49 = vpop.f32.mrf.mxu0 }
 0x2f5   : > { %v2366_v36 = vpop.f32.mrf.mxu1 }
 0x2f6   : > { %v1057_v59 = vadd.f32 %v2378_v33, %v2366_v36 }
 0x2f7   : > { %v2382_v37 = vpop.f32.mrf.mxu0  ;;  %v963_v62 = vpop.f32.mrf.mxu1 }
 0x2f8   : > { %v1049_v63 = vadd.f32 %v1048_v34, %v963_v62 }
 0x2f9   : > { %v1064_v38 = vpop.f32.mrf.mxu0  ;;  %v2367_v31 = vpop.f32.mrf.mxu1 }
 0x2fa   : > { %v1060_v2 = vadd.f32 %v2379_v35, %v2367_v31 }
 0x2fb   : > { %v2383_v16 = vpop.f32.mrf.mxu0  ;;  %v966_v39 = vpop.f32.mrf.mxu1 }
 0x2fc   : > { %v1052_v5 = vadd.f32 %v1051_v49, %v966_v39 }
 0x2fd   : > { %v1067_v40 = vpop.f32.mrf.mxu0  ;;  %v2370_v41 = vpop.f32.mrf.mxu1 }
 0x2fe   : > { %v1073_v11 = vadd.f32 %v2382_v37, %v2370_v41 }
 0x2ff   : > { %v2402_v42 = vpop.f32.mrf.mxu0  ;;  %v979_v43 = vpop.f32.mrf.mxu1 }
 0x300   : > { %v1065_v10 = vadd.f32 %v1064_v38, %v979_v43 }
 0x301   : > { %v1267_v44 = vpop.f32.mrf.mxu0  ;;  %v2371_v45 = vpop.f32.mrf.mxu1 }
 0x303   : > { %v2403_v46 = vpop.f32.mrf.mxu0  ;;  %v982_v47 = vpop.f32.mrf.mxu1 }
 0x304   : > { %v1068_v28 = vadd.f32 %v1067_v40, %v982_v47 }
 0x305   : > { %v1270_v48 = vpop.f32.mrf.mxu0  ;;  %v2390_v50 = vpop.f32.mrf.mxu1 }
 0x306   : > { %v1184_v0 = vadd.f32 %v2390_v50, %v1057_v59 }
 0x307   : > { %v2406_v51 = vpop.f32.mrf.mxu0  ;;  %v1152_v52 = vpop.f32.mrf.mxu1 }
 0x308   : > { %v1182_v3 = vadd.f32 %v1152_v52, %v1049_v63  ;;  %v1299_v7 = vadd.f32 %v2402_v42, %v1184_v0 }
 0x309   : > { %v1283_v53 = vpop.f32.mrf.mxu0  ;;  %v2391_v54 = vpop.f32.mrf.mxu1 }
 0x30a   : > { %v1185_v6 = vadd.f32 %v2391_v54, %v1060_v2  ;;  %v1297_v14 = vadd.f32 %v1267_v44, %v1182_v3 }
 0x30b   : > { %v2407_v56 = vpop.f32.mrf.mxu0  ;;  %v1155_v57 = vpop.f32.mrf.mxu1 }
 0x30c   : > { %v1183_v12 = vadd.f32 %v1155_v57, %v1052_v5  ;;  %v1300_v21 = vadd.f32 %v2403_v46, %v1185_v6 }
 0x30d   : > { %v2394_v58 = vpop.f32.mrf.mxu1  ;;  %v1286_v37 = vpop.f32.mrf.mxu0 }
 0x30e   : > { %v1188_v17 = vadd.f32 %v2394_v58, %v1073_v11  ;;  %v1298_v26 = vadd.f32 %v1270_v48, %v1183_v12  ;;  %v2511_v12 = vld [vmem:[%s2945_s2 + $0x68] sm:$0xff]  }
 0x30f   : > { %v1168_v60 = vpop.f32.mrf.mxu1  ;;  %2420 = vmatprep.subr.bf16.mxu0 %v2511_v12 }
 0x310   : > { %v1186_v23 = vadd.f32 %v1168_v60, %v1065_v10  ;;  %v1303_v61 = vadd.f32 %v2406_v51, %v1188_v17  ;;  %2421 = vmatpush3.bf16.msra.mxu0 %v2511_v12 }
 0x311   : > { %v2395_v1 = vpop.f32.mrf.mxu1 }
 0x312   : > { %v1301_v34 = vadd.f32 %v1283_v53, %v1186_v23 }
 0x313   : > { %v1171_v4 = vpop.f32.mrf.mxu1 }
 0x314   : > { %v1187_v19 = vadd.f32 %v1171_v4, %v1068_v28  ;;  %v2512_v28 = vld [vmem:[%s2945_s2 + $0x58] sm:$0xff]  }
 0x315   : > { %v2414_v8 = vpop.f32.mrf.mxu1  ;;  %2428 = vmatprep.subr.bf16.mxu1 %v2512_v28 }
 0x316   : > { %v1406_v13 = vadd.f32 %v2414_v8, %v1299_v7  ;;  %v1302_v31 = vadd.f32 %v1286_v37, %v1187_v19  ;;  %2429 = vmatpush3.bf16.msra.mxu1 %v2512_v28 }
 0x317   : > { %v1374_v15 = vpop.f32.mrf.mxu1 }
 0x318   : > { %v1420_v18 = vadd.f32 %v2181_v9, %v1406_v13  ;;  %v1404_v20 = vadd.f32 %v1374_v15, %v1297_v14 }
 0x319   : > { %v2415_v22 = vpop.f32.mrf.mxu1 }
 0x31a   : > { %1427 = vst.msk [vmem:[#allocation2 + $0x10] sm:$0xff] %vm764_vm6, %v1420_v18  ;;  %v1418_v24 = vadd.f32 %v2181_v9, %v1404_v20  ;;  %v1407_v25 = vadd.f32 %v2415_v22, %v1300_v21 }
 0x31b   : > { %v1377_v27 = vpop.f32.mrf.mxu1 }
 0x31c   : > { %1425 = vst.msk [vmem:[#allocation2] sm:$0xff] %vm764_vm6, %v1418_v24  ;;  %v1421_v55 = vadd.f32 %v2181_v9, %v1407_v25  ;;  %v1405_v29 = vadd.f32 %v1377_v27, %v1298_v26 }
 0x31d   : > { %v2418_v30 = vpop.f32.mrf.mxu1 }
 0x31e   : > { %1428 = vst.msk [vmem:[#allocation2 + $0x18] sm:$0xff] %vm764_vm6, %v1421_v55  ;;  %v1419_v32 = vadd.f32 %v2181_v9, %v1405_v29  ;;  %v1410_v33 = vadd.f32 %v2418_v30, %v1303_v61  ;;  %v2513_v55 = vld [vmem:[%s2945_s2 + $0x50] sm:$0xff]   ;;  %v2514_v29 = vld [vmem:[%s2945_s2 + $0x60] sm:$0xff]   ;;  %v2515_v61 = vld [vmem:[%s2945_s2 + $0x88] sm:$0xff]  }
 0x31f   : > { %v1390_v35 = vpop.f32.mrf.mxu1  ;;  %2422 = vmatprep.subr.bf16.mxu0 %v2514_v29  ;;  %2430 = vmatprep.subr.bf16.mxu1 %v2513_v55  ;;  %v2517_v30 = vld [vmem:[%s2945_s2 + $0x78] sm:$0xff]  }
 0x320   : > { %1426 = vst.msk [vmem:[#allocation2 + $0x8] sm:$0xff] %vm764_vm6, %v1419_v32  ;;  %v1424_v49 = vadd.f32 %v2181_v9, %v1410_v33  ;;  %v1408_v36 = vadd.f32 %v1390_v35, %v1301_v34  ;;  %2423 = vmatpush3.bf16.msra.mxu0 %v2514_v29  ;;  %2431 = vmatpush3.bf16.msra.mxu1 %v2513_v55 }
 0x321   : > { %v2419_v62 = vpop.f32.mrf.mxu1  ;;  %2444 = vmatprep.subr.bf16.mxu1 %v2515_v61  ;;  %2436 = vmatprep.subr.bf16.mxu0 %v2517_v30 }
 0x322   : > { %1431 = vst.msk [vmem:[#allocation2 + $0x30] sm:$0xff] %vm764_vm6, %v1424_v49  ;;  %v1422_v38 = vadd.f32 %v2181_v9, %v1408_v36 }
 0x323   : > { %v1393_v16 = vpop.f32.mrf.mxu1 }
 0x324   : > { %1429 = vst.msk [vmem:[#allocation2 + $0x20] sm:$0xff] %vm764_vm6, %v1422_v38  ;;  %v1409_v39 = vadd.f32 %v1393_v16, %v1302_v31 }
 0x325   : > { %v1434_v41 = vld [vmem:[#allocation2 + $0x10] ss:$2 sm:$0xff]  ;;  %v1442_v44 = vld [vmem:[#allocation2 + $0x11] ss:$2 sm:$0xff] }
 0x326   : > { %v1423_v40 = vadd.f32 %v2181_v9, %v1409_v39  ;;  %v2842_v46 = vmax.f32 %v1434_v41, %v1442_v44 }
 0x327   : > { %v1432_v42 = vld [vmem:[#allocation2] ss:$2 sm:$0xff]  ;;  %v1440_v43 = vld [vmem:[#allocation2 + $0x1] ss:$2 sm:$0xff] }
 0x328   : > { %1430 = vst.msk [vmem:[#allocation2 + $0x28] sm:$0xff] %vm764_vm6, %v1423_v40  ;;  %v2840_v45 = vmax.f32 %v1432_v42, %v1440_v43  ;;  %v1468_v52 = vmul.f32 %v2842_v46, %v2842_v46  ;;  %v1452_v58 = vsel %vm764_vm6, %v2842_v46, 0.0 }
 0x329   : > { %v1438_v48 = vld [vmem:[#allocation2 + $0x30] ss:$2 sm:$0xf]  ;;  %v1446_v50 = vld [vmem:[#allocation2 + $0x31] ss:$2 sm:$0xf] }
 0x32a   : > { %v1467_v47 = vmul.f32 %v2840_v45, %v2840_v45  ;;  %v1451_v51 = vsel %vm764_vm6, %v2840_v45, 0.0  ;;  %v2852_v57 = vmax.f32 %v1438_v48, %v1446_v50  ;;  %v1472_v1 = vsel %vm764_vm6, %v1468_v52, 0.0 }
 0x32b   : > { %v1453_v60 = vadd.f32 %v1452_v58, %v1451_v51 }
 0x32c   : > { %v1471_v59 = vsel %vm764_vm6, %v1467_v47, 0.0  ;;  %v1456_v4 = vsel %vm778_vm7, %v2852_v57, 0.0  ;;  %v1470_v5 = vmul.f32 %v2852_v57, %v2852_v57 }
 0x32d   : > { %v1473_v3 = vadd.f32 %v1472_v1, %v1471_v59 }
 0x32e   : > { %v1476_v9 = vsel %vm778_vm7, %v1470_v5, 0.0 }
 0x32f   : > { %v1436_v53 = vld [vmem:[#allocation2 + $0x20] ss:$2 sm:$0xff]  ;;  %v1444_v54 = vld [vmem:[#allocation2 + $0x21] ss:$2 sm:$0xff] }
 0x330   : > { %v2850_v56 = vmax.f32 %v1436_v53, %v1444_v54 }
 0x332   : > { %v1454_v63 = vsel %vm764_vm6, %v2850_v56, 0.0  ;;  %v1469_v0 = vmul.f32 %v2850_v56, %v2850_v56 }
 0x333   : > { %v1455_v2 = vadd.f32 %v1454_v63, %v1453_v60 }
 0x334   : > { %v1474_v6 = vsel %vm764_vm6, %v1469_v0, 0.0 }
 0x335   : > { %v1457_v7 = vadd.f32 %v1456_v4, %v1455_v2  ;;  %v1475_v8 = vadd.f32 %v1474_v6, %v1473_v3  ;;  %v2518_v4 = vld [vmem:[%s2945_s2 + $0x70] sm:$0xff]  }
 0x337   : > { %1458 = vadd.xlane.f32.xlu1 %v1457_v7  ;;  %v1477_v11 = vadd.f32 %v1476_v9, %v1475_v8  ;;  %v2519_v7 = vld [vmem:[%s2945_s2 + $0x98] sm:$0xff]  }
 0x33b   : > { %1478 = vadd.xlane.f32.xlu1 %v1477_v11  ;;  %v2520_v11 = vld [vmem:[%s2945_s2 + $0x90] sm:$0xff]  }
 0x3c0   : > { %v1459_v13 = vpop.xlane.xlu1 %1458 }
 0x3c1   : > { %v1460_v14 = vrot.slane %v1459_v13, 4 }
 0x3c3   : > { %v1461_v10 = vadd.f32 %v1460_v14, %v1459_v13 }
 0x3c4   : > { %v1479_v15 = vpop.xlane.xlu1 %1478 }
 0x3c5   : > { %v1462_v17 = vrot.slane %v1461_v10, 2  ;;  %v1480_v18 = vrot.slane %v1479_v15, 4 }
 0x3c7   : > { %v1481_v20 = vadd.f32 %v1480_v18, %v1479_v15  ;;  %v1463_v21 = vadd.f32 %v1462_v17, %v1461_v10 }
 0x3c9   : > { %v1482_v22 = vrot.slane %v1481_v20, 2  ;;  %v1464_v23 = vrot.slane %v1463_v21, 1 }
 0x3cb   : > { %v1465_v24 = vadd.f32 %v1464_v23, %v1463_v21  ;;  %v1483_v25 = vadd.f32 %v1482_v22, %v1481_v20 }
 0x3cd   : > { %2479 = vpush %v1465_v24  ;;  %v1484_v26 = vrot.slane %v1483_v25, 1 }
 0x3cf   : > { %v1485_v27 = vadd.f32 %v1484_v26, %v1483_v25 }
 0x3d1   : > { %2481 = vpush %v1485_v27 }
 0x3fe   : > { %s2480_s11 = spop %2479 }
 0x3ff   : > { %s1489_s12 = smul.f32 0.0011160715, %s2480_s11 }
 0x401   : > { %s1493_s13 = smul.f32 %s1489_s12, %s1489_s12  ;;  %v1495_v33 = vstv %s1489_s12 }
 0x402   : > { %s2482_s14 = spop %2481  ;;  %v1496_v34 = vsub.f32 %v2840_v45, %v1495_v33  ;;  %v1497_v35 = vsub.f32 %v2842_v46, %v1495_v33  ;;  %v1498_v49 = vsub.f32 %v2850_v56, %v1495_v33  ;;  %v1499_v36 = vsub.f32 %v2852_v57, %v1495_v33  ;;  %v2516_v45 = vld [vmem:[%s2945_s2 + $0x80] sm:$0xff]  }
 0x403   : > { %s1492_s15 = smul.f32 0.0011160715, %s2482_s14 }
 0x405   : > { %s1494_s16 = ssub.f32 %s1492_s15, %s1493_s13 }
 0x407   : > { %s1500_s17 = sadd.f32 0.007, %s1494_s16 }
 0x409   : > { %v1501_v19 = vstv %s1500_s17 }
 0x40a   : > { %2525 = vrsqrt.f32 %v1501_v19 }
 0x417   : > { %v2526_v32 = vpop.eup %2525 }
 0x418   : > { %2483 = vpush %v2526_v32 }
 0x449   : > { %s2484_s18 = spop %2483 }
 0x44a   : > { %v1504_v37 = vstv %s2484_s18 }
 0x44b   : > { %v1505_v62 = vmul.f32 %v1504_v37, %v1496_v34  ;;  %v1506_v38 = vmul.f32 %v1504_v37, %v1497_v35  ;;  %v1507_v31 = vmul.f32 %v1504_v37, %v1498_v49  ;;  %v1508_v16 = vmul.f32 %v1504_v37, %v1499_v36  ;;  %v2223_v34 = vld [vmem:[%s2946_s3 + $0x1] ss:$0 sm:$0xff] }
 0x44d   : > { %v1509_v39 = vmax.f32 %v1505_v62, 0.0  ;;  %v1510_v40 = vmax.f32 %v1506_v38, 0.0  ;;  %v1511_v41 = vmax.f32 %v1507_v31, 0.0  ;;  %v1512_v42 = vmax.f32 %v1508_v16, 0.0 }
 0x44f   : > { %v1513_v43 = vpack.c.bf16 %v1510_v40, %v1509_v39  ;;  %v1514_v44 = vpack.c.bf16 %v1511_v41, %v1511_v41  ;;  %v1520_v47 = vpack.c.bf16 %v1512_v42, %v1511_v41 }
 0x451   : > { %2432 = vmatprep.mubr.msk.bf16.mxu1 %vm764_vm6, %v1513_v43  ;;  %v1527_v46 = vshrl.u32 %v1513_v43, 16  ;;  %v1529_v48 = vshll.u32 %v1513_v43, 16  ;;  %v1534_v50 = vshll.u32 %v1520_v47, 16  ;;  %v1538_v51 = vshrl.u32 %v1520_v47, 16 }
 0x452   : > { %2433 = vmatmul.mubr.msk.bf16.vlgmr.msra.gmra.mxu1 %vm764_vm6, %v1514_v44  ;;  %v1679_v63 = vrot.slane %v1513_v43, 1  ;;  %v1680_v0 = vrot.slane %v1520_v47, 1  ;;  %v1837_v8 = vrot.slane %v1513_v43, 2  ;;  %v1838_v9 = vrot.slane %v1520_v47, 2 }
 0x453   : > { %2445 = vmatpush3.bf16.msra.mxu1 %v2515_v61  ;;  %v1531_v52 = vrot.slane %v1529_v48, 1  ;;  %v1536_v53 = vrot.slane %v1534_v50, 1  ;;  %v1756_v54 = vrot.slane %v1527_v46, 1  ;;  %v1757_v56 = vrot.slane %v1529_v48, 2 }
 0x454   : > { %2446 = vmatprep.subr.bf16.mxu1 %v2516_v45  ;;  %v1759_v57 = vrot.slane %v1538_v51, 1  ;;  %v1760_v58 = vrot.slane %v1534_v50, 2  ;;  %v1681_v6 = vsel %vm464_vm4, %v1679_v63, %v1680_v0  ;;  %v1839_v12 = vsel %vm668_vm5, %v1837_v8, %v1838_v9 }
 0x455   : > { %v1532_v59 = vor.u32 %v1531_v52, %v1527_v46  ;;  %v1758_v60 = vor.u32 %v1757_v56, %v1756_v54  ;;  %v1540_v3 = vor.u32 %v1538_v51, %v1536_v53 }
 0x456   : > { %v1761_v1 = vor.u32 %v1760_v58, %v1759_v57 }
 0x457   : > { %2447 = vmatpush3.bf16.msra.mxu1 %v2516_v45  ;;  %v1537_v2 = vsel %vm268_vm2, %v1532_v59, %v1536_v53 }
 0x458   : > { %2424 = vmatprep.mubr.msk.bf16.mxu0 %vm764_vm6, %v1537_v2  ;;  %v1762_v5 = vsel %vm562_vm3, %v1758_v60, %v1761_v1  ;;  %v2537_v60 = vmov 0.0  }
 0x459   : > { %2448 = vmatprep.mubr.msk.bf16.mxu1 %vm764_vm6, %v1762_v5  ;;  %2425 = vmatmul.mubr.msk.bf16.vlgmr.msra.gmra.mxu0 %vm764_vm6, %v1540_v3 }
 0x45a   : > { %2437 = vmatpush3.bf16.msra.mxu0 %v2517_v30  ;;  %2440 = vmatprep.mubr.msk.bf16.mxu0 %vm764_vm6, %v1681_v6 }
 0x45b   : > { %2449 = vmatmul.mubr.msk.bf16.vlgmr.msra.gmra.mxu1 %vm764_vm6, %v1761_v1  ;;  %2438 = vmatprep.subr.bf16.mxu0 %v2518_v4 }
 0x45c   : > { %2460 = vmatprep.subr.bf16.mxu1 %v2537_v60  ;;  %2464 = vmatprep.mubr.msk.bf16.mxu1 %vm2538_vm8, %v2537_v60 }
 0x45e   : > { %2439 = vmatpush3.bf16.msra.mxu0 %v2518_v4 }
 0x45f   : > { %2452 = vmatprep.subr.bf16.mxu0 %v2519_v7 }
 0x461   : > { %2441 = vmatmul.mubr.msk.bf16.vlgmr.msra.gmra.mxu0 %vm764_vm6, %v1680_v0 }
 0x462   : > { %2453 = vmatpush3.bf16.msra.mxu0 %v2519_v7  ;;  %2456 = vmatprep.mubr.msk.bf16.mxu0 %vm764_vm6, %v1839_v12 }
 0x463   : > { %2454 = vmatprep.subr.bf16.mxu0 %v2520_v11 }
 0x466   : > { %2455 = vmatpush3.bf16.msra.mxu0 %v2520_v11 }
 0x469   : > { %2457 = vmatmul.mubr.msk.bf16.vlgmr.msra.gmra.mxu0 %vm764_vm6, %v1838_v9 }
 0x512   : > { %v2434_v13 = vpop.f32.mrf.mxu1 }
 0x514   : > { %v1658_v14 = vpop.f32.mrf.mxu1 }
 0x516   : > { %v2435_v10 = vpop.f32.mrf.mxu1 }
 0x517   : > { %v2522_v10 = vld [vmem:[%s2947_s4] sm:$0xff]  }
 0x518   : > { %v1661_v15 = vpop.f32.mrf.mxu1 }
 0x519   : > { %v2426_v17 = vpop.f32.mrf.mxu0 }
 0x51a   : > { %v1667_v26 = vadd.f32 %v2434_v13, %v2426_v17 }
 0x51b   : > { %v2450_v18 = vpop.f32.mrf.mxu1  ;;  %v1593_v20 = vpop.f32.mrf.mxu0 }
 0x51c   : > { %v1659_v28 = vadd.f32 %v1658_v14, %v1593_v20  ;;  %v2521_v14 = vld [vmem:[%s2947_s4 + $0x8] sm:$0xff]  }
 0x51d   : > { %v1815_v21 = vpop.f32.mrf.mxu1  ;;  %v2427_v22 = vpop.f32.mrf.mxu0  ;;  %2461 = vmatpush3.bf16.msra.mxu1 %v2521_v14 }
 0x51e   : > { %2462 = vmatprep.subr.bf16.mxu1 %v2537_v60 }
 0x51f   : > { %v2451_v23 = vpop.f32.mrf.mxu1  ;;  %v1596_v24 = vpop.f32.mrf.mxu0 }
 0x520   : > { %v1662_v19 = vadd.f32 %v1661_v15, %v1596_v24 }
 0x521   : > { %v2442_v25 = vpop.f32.mrf.mxu0  ;;  %v1818_v31 = vpop.f32.mrf.mxu1  ;;  %2463 = vmatpush3.bf16.msra.mxu1 %v2522_v10 }
 0x522   : > { %v1750_v55 = vadd.f32 %v2442_v25, %v1667_v26 }
 0x523   : > { %v1734_v27 = vpop.f32.mrf.mxu0 }
 0x524   : > { %v1748_v61 = vadd.f32 %v1734_v27, %v1659_v28  ;;  %v1831_v32 = vadd.f32 %v2450_v18, %v1750_v55  ;;  %v2224_v28 = vld [vmem:[%s2948_s5] ss:$0 sm:$0xff] }
 0x525   : > { %v2443_v29 = vpop.f32.mrf.mxu0 }
 0x526   : > { %v1829_v36 = vadd.f32 %v1815_v21, %v1748_v61 }
 0x527   : > { %v1737_v30 = vpop.f32.mrf.mxu0 }
 0x528   : > { %v1749_v35 = vadd.f32 %v1737_v30, %v1662_v19 }
 0x529   : > { %v2458_v33 = vpop.f32.mrf.mxu0 }
 0x52a   : > { %v1908_v49 = vadd.f32 %v2458_v33, %v1831_v32  ;;  %v1830_v40 = vadd.f32 %v1818_v31, %v1749_v35 }
 0x52b   : > { %v1892_v37 = vpop.f32.mrf.mxu0 }
 0x52c   : > { %v1919_v62 = vadd.f32 %v2223_v34, %v1908_v49  ;;  %v1906_v38 = vadd.f32 %v1892_v37, %v1829_v36 }
 0x52d   : > { %v2459_v16 = vpop.f32.mrf.mxu0 }
 0x52e   : > { %1922 = vst.msk [vmem:[#allocation2 + $0x10] sm:$0xff] %vm764_vm6, %v1919_v62  ;;  %v1917_v39 = vadd.f32 %v2223_v34, %v1906_v38 }
 0x52f   : > { %v1895_v41 = vpop.f32.mrf.mxu0 }
 0x530   : > { %1920 = vst.msk [vmem:[#allocation2] sm:$0xff] %vm764_vm6, %v1917_v39  ;;  %v1907_v42 = vadd.f32 %v1895_v41, %v1830_v40 }
 0x532   : > { %v1918_v43 = vadd.f32 %v2223_v34, %v1907_v42 }
 0x534   : > { %1921 = vst.msk [vmem:[#allocation2 + $0x8] sm:$0xff] %vm764_vm6, %v1918_v43 }
 0x535   : > { %v1924_v44 = vld [vmem:[#allocation2 + $0x10] ss:$2 sm:$0xf]  ;;  %v1926_v47 = vld [vmem:[#allocation2 + $0x11] ss:$2 sm:$0xf] }
 0x536   : > { %v1928_v45 = vmax.f32 %v1924_v44, %v1926_v47 }
 0x538   : > { %v1942_v51 = vmul.f32 %v1928_v45, %v1928_v45  ;;  %v1930_v53 = vsel %vm778_vm7, %v1928_v45, 0.0 }
 0x53a   : > { %v1944_v58 = vsel %vm778_vm7, %v1942_v51, 0.0 }
 0x53b   : > { %v1923_v46 = vld [vmem:[#allocation2] ss:$2 sm:$0xff]  ;;  %v1925_v48 = vld [vmem:[#allocation2 + $0x1] ss:$2 sm:$0xff] }
 0x53c   : > { %v1927_v50 = vmax.f32 %v1923_v46, %v1925_v48 }
 0x53e   : > { %v1929_v52 = vsel %vm764_vm6, %v1927_v50, 0.0  ;;  %v1941_v54 = vmul.f32 %v1927_v50, %v1927_v50 }
 0x53f   : > { %v1931_v56 = vadd.f32 %v1930_v53, %v1929_v52 }
 0x540   : > { %v1943_v57 = vsel %vm764_vm6, %v1941_v54, 0.0 }
 0x541   : > { %1932 = vadd.xlane.f32.xlu0 %v1931_v56  ;;  %v1945_v59 = vadd.f32 %v1944_v58, %v1943_v57 }
 0x543   : > { %1946 = vadd.xlane.f32.xlu1 %v1945_v59 }
 0x5ca   : > { %v1933_v63 = vpop.xlane.xlu0 %1932 }
 0x5cb   : > { %v1934_v0 = vrot.slane %v1933_v63, 4 }
 0x5cc   : > { %v1947_v1 = vpop.xlane.xlu1 %1946 }
 0x5cd   : > { %v1935_v2 = vadd.f32 %v1934_v0, %v1933_v63  ;;  %v1948_v3 = vrot.slane %v1947_v1, 4 }
 0x5cf   : > { %v1936_v4 = vrot.slane %v1935_v2, 2  ;;  %v1949_v5 = vadd.f32 %v1948_v3, %v1947_v1 }
 0x5d1   : > { %v1937_v6 = vadd.f32 %v1936_v4, %v1935_v2  ;;  %v1950_v7 = vrot.slane %v1949_v5, 2 }
 0x5d3   : > { %v1951_v8 = vadd.f32 %v1950_v7, %v1949_v5  ;;  %v1938_v9 = vrot.slane %v1937_v6, 1 }
 0x5d5   : > { %v1939_v11 = vadd.f32 %v1938_v9, %v1937_v6  ;;  %v1952_v12 = vrot.slane %v1951_v8, 1 }
 0x5d7   : > { %2485 = vpush %v1939_v11  ;;  %v1953_v13 = vadd.f32 %v1952_v12, %v1951_v8 }
 0x5d9   : > { %2487 = vpush %v1953_v13 }
 0x608   : > { %s2486_s11 = spop %2485 }
 0x609   : > { %s1957_s12 = smul.f32 0.0026041667, %s2486_s11 }
 0x60a   : > { %s2488_s13 = spop %2487 }
 0x60b   : > { %s1961_s14 = smul.f32 %s1957_s12, %s1957_s12  ;;  %v1963_v18 = vstv %s1957_s12 }
 0x60c   : > { %s1960_s15 = smul.f32 0.0026041667, %s2488_s13  ;;  %v1964_v20 = vsub.f32 %v1927_v50, %v1963_v18  ;;  %v1965_v21 = vsub.f32 %v1928_v45, %v1963_v18 }
 0x60e   : > { %s1962_s16 = ssub.f32 %s1960_s15, %s1961_s14 }
 0x610   : > { %s1966_s17 = sadd.f32 0.007, %s1962_s16 }
 0x612   : > { %v1967_v15 = vstv %s1966_s17 }
 0x613   : > { %2527 = vrsqrt.f32 %v1967_v15 }
 0x620   : > { %v2528_v17 = vpop.eup %2527 }
 0x621   : > { %2489 = vpush %v2528_v17 }
 0x652   : > { %s2490_s18 = spop %2489 }
 0x653   : > { %v1970_v22 = vstv %s2490_s18 }
 0x654   : > { %v1971_v23 = vmul.f32 %v1970_v22, %v1964_v20  ;;  %v1972_v24 = vmul.f32 %v1970_v22, %v1965_v21 }
 0x656   : > { %v1973_v25 = vmax.f32 %v1971_v23, 0.0  ;;  %v1974_v26 = vmax.f32 %v1972_v24, 0.0 }
 0x658   : > { %v1975_v27 = vpack.c.bf16 %v1974_v26, %v1973_v25 }
 0x65a   : > { %2465 = vmatmul.mubr.msk.bf16.vlgmr.msra.gmra.mxu1 %vm764_vm6, %v1975_v27 }
 0x71a   : > { %v2036_v55 = vpop.f32.mrf.mxu1 }
 0x71b   : > { %v2037_v29 = vadd.f32 %v2224_v28, %v2036_v55 }
 0x71c   : > { %v2466_v61 = vpop.f32.mrf.mxu1 }
 0x71d   : > { %2044 = vst.msk [vmem:[%s251_s26] sm:$0xff] %vm2043_vm9, %v2037_v29 }
 0x71e   : > { %v2039_v30 = vpop.f32.mrf.mxu1 }
 0x71f   : > { %v2040_v19 = vadd.f32 %v2224_v28, %v2039_v30 }
 0x720   : > { %v2467_v32 = vpop.f32.mrf.mxu1 }
 0x721   : > { %2046 = vst.msk [vmem:[%s251_s26 + $0x8] sm:$0xf] %vm2045_vm10, %v2040_v19 }
 0x722 PF: > { %s16_s21 = sadd.s32 1, %s2535_s21  }
 0x723   : > { %p13_p4 = scmp.ge.s32.totalorder %s16_s21, 4  }
 0x725   :  { %15 = sbr.rel (!%p13_p4) target bundleno = 1 (0x1), region = 95 }

</bundles_post_ra>
